<compile_context>
chip_gen: v7x
topology: tpu7x:2x2x1
jax: 0.10.0
libtpu: 0.0.40
codegen_flags: <defaults>
</compile_context>

<pallas_src>
import functools

import jax
import jax.numpy as jnp
from jax.experimental import pallas as pl
from jax.experimental.pallas import tpu as pltpu

_NEG = -1e9
_VMEM_LIMIT = 32 * 1024 * 1024  # safe on v5e/v6e/v7x


def _pick_tile(dim, target):
    """Largest divisor of `dim` that is <= target (dim itself if dim <= target)."""
    if dim <= target:
        return dim
    for t in range(target, 0, -1):
        if dim % t == 0:
            return t
    return dim


# --------------------------------------------------------------------------
# Tiled linear kernels (bias [+ GELU] | bias + residual + LayerNorm epilogue)
# --------------------------------------------------------------------------

def _linear_kernel(x_ref, w_ref, b_ref, o_ref, acc_ref, *, activation):
    @pl.when(pl.program_id(2) == 0)
    def _():
        acc_ref[...] = jnp.zeros_like(acc_ref)

    acc_ref[...] += jnp.dot(x_ref[...].astype(jnp.bfloat16),
                            w_ref[...].astype(jnp.bfloat16),
                            preferred_element_type=jnp.float32)

    @pl.when(pl.program_id(2) == pl.num_programs(2) - 1)
    def _():
        y = acc_ref[...] + b_ref[...]
        if activation == "gelu":
            # exact (erf) GELU, matching torch.nn.functional.gelu default
            y = 0.5 * y * (1.0 + jax.lax.erf(y * 0.7071067811865476))
        o_ref[...] = y.astype(o_ref.dtype)


def linear(x, w, b, activation="none", tm=256, tn=256, tk=512):
    """x: (M, K), w: (K, N), b: (N,) -> (M, N), tiled with K-axis accumulation."""
    M, K = x.shape
    N = w.shape[1]
    tm, tn, tk = _pick_tile(M, tm), _pick_tile(N, tn), _pick_tile(K, tk)
    grid = (M // tm, N // tn, K // tk)
    cost = pl.CostEstimate(
        flops=2 * M * N * K,
        transcendentals=(M * N if activation == "gelu" else 0),
        bytes_accessed=4 * (M * K + K * N + M * N + N))
    return pl.pallas_call(
        functools.partial(_linear_kernel, activation=activation),
        out_shape=jax.ShapeDtypeStruct((M, N), x.dtype),
        grid=grid,
        in_specs=[
            pl.BlockSpec((tm, tk), lambda i, j, k: (i, k)),
            pl.BlockSpec((tk, tn), lambda i, j, k: (k, j)),
            pl.BlockSpec((1, tn), lambda i, j, k: (0, j)),
        ],
        out_specs=pl.BlockSpec((tm, tn), lambda i, j, k: (i, j)),
        scratch_shapes=[pltpu.VMEM((tm, tn), jnp.float32)],
        compiler_params=pltpu.CompilerParams(
            dimension_semantics=("parallel", "parallel", "arbitrary"),
            vmem_limit_bytes=_VMEM_LIMIT),
        cost_estimate=cost,
    )(x, w, b.reshape(1, N))


def _linear_res_ln_kernel(x_ref, w_ref, b_ref, res_ref, g_ref, beta_ref,
                          o_ref, acc_ref, *, eps):
    @pl.when(pl.program_id(2) == 0)
    def _():
        acc_ref[...] = jnp.zeros_like(acc_ref)

    acc_ref[...] += jnp.dot(x_ref[...].astype(jnp.bfloat16),
                            w_ref[...].astype(jnp.bfloat16),
                            preferred_element_type=jnp.float32)

    @pl.when(pl.program_id(2) == pl.num_programs(2) - 1)
    def _():
        y = acc_ref[...] + b_ref[...] + res_ref[...].astype(jnp.float32)
        mean = jnp.mean(y, axis=-1, keepdims=True)
        var = jnp.mean(jnp.square(y - mean), axis=-1, keepdims=True)
        yn = (y - mean) * jax.lax.rsqrt(var + eps)
        o_ref[...] = (yn * g_ref[...] + beta_ref[...]).astype(o_ref.dtype)


def linear_res_ln(x, w, b, res, g, beta, eps=1e-5, tm=256, tk=512):
    """out = LayerNorm(res + x @ w + b).  N (= d_model) kept as a single lane tile."""
    M, K = x.shape
    N = w.shape[1]
    tm, tk = _pick_tile(M, tm), _pick_tile(K, tk)
    grid = (M // tm, 1, K // tk)
    cost = pl.CostEstimate(flops=2 * M * N * K + 8 * M * N, transcendentals=M,
                           bytes_accessed=4 * (M * K + K * N + 2 * M * N + 3 * N))
    return pl.pallas_call(
        functools.partial(_linear_res_ln_kernel, eps=eps),
        out_shape=jax.ShapeDtypeStruct((M, N), x.dtype),
        grid=grid,
        in_specs=[
            pl.BlockSpec((tm, tk), lambda i, j, k: (i, k)),
            pl.BlockSpec((tk, N), lambda i, j, k: (k, 0)),
            pl.BlockSpec((1, N), lambda i, j, k: (0, 0)),
            pl.BlockSpec((tm, N), lambda i, j, k: (i, 0)),
            pl.BlockSpec((1, N), lambda i, j, k: (0, 0)),
            pl.BlockSpec((1, N), lambda i, j, k: (0, 0)),
        ],
        out_specs=pl.BlockSpec((tm, N), lambda i, j, k: (i, 0)),
        scratch_shapes=[pltpu.VMEM((tm, N), jnp.float32)],
        compiler_params=pltpu.CompilerParams(
            dimension_semantics=("parallel", "parallel", "arbitrary"),
            vmem_limit_bytes=_VMEM_LIMIT),
        cost_estimate=cost,
    )(x, w, b.reshape(1, N), res, g.reshape(1, N), beta.reshape(1, N))


# --------------------------------------------------------------------------
# LM head: logits = x @ emb.T + bias, tiled over vocab, no host-side transpose
# --------------------------------------------------------------------------

def _lm_head_kernel(x_ref, w_ref, b_ref, o_ref, acc_ref):
    @pl.when(pl.program_id(2) == 0)
    def _():
        acc_ref[...] = jnp.zeros_like(acc_ref)

    acc_ref[...] += jax.lax.dot_general(
        x_ref[...].astype(jnp.bfloat16), w_ref[...].astype(jnp.bfloat16),
        (((1,), (1,)), ((), ())), preferred_element_type=jnp.float32)

    @pl.when(pl.program_id(2) == pl.num_programs(2) - 1)
    def _():
        o_ref[...] = (acc_ref[...] + b_ref[...]).astype(o_ref.dtype)


def lm_head(x, emb, bias, tm=256, tv=512, tk=512):
    """x: (M, D), emb: (V, D), bias: (V,) -> (M, V)."""
    M, D = x.shape
    V = emb.shape[0]
    tm, tv, tk = _pick_tile(M, tm), _pick_tile(V, tv), _pick_tile(D, tk)
    grid = (M // tm, V // tv, D // tk)
    cost = pl.CostEstimate(flops=2 * M * V * D, transcendentals=0,
                           bytes_accessed=4 * (M * D + V * D + M * V + V))
    return pl.pallas_call(
        _lm_head_kernel,
        out_shape=jax.ShapeDtypeStruct((M, V), x.dtype),
        grid=grid,
        in_specs=[
            pl.BlockSpec((tm, tk), lambda i, j, k: (i, k)),
            pl.BlockSpec((tv, tk), lambda i, j, k: (j, k)),
            pl.BlockSpec((1, tv), lambda i, j, k: (0, j)),
        ],
        out_specs=pl.BlockSpec((tm, tv), lambda i, j, k: (i, j)),
        scratch_shapes=[pltpu.VMEM((tm, tv), jnp.float32)],
        compiler_params=pltpu.CompilerParams(
            dimension_semantics=("parallel", "parallel", "arbitrary"),
            vmem_limit_bytes=_VMEM_LIMIT),
        cost_estimate=cost,
    )(x, emb, bias.reshape(1, V))


# --------------------------------------------------------------------------
# Standalone LayerNorm (post-embedding LN)
# --------------------------------------------------------------------------

def _layernorm_kernel(x_ref, g_ref, b_ref, o_ref, *, eps):
    x = x_ref[...].astype(jnp.float32)
    mean = jnp.mean(x, axis=-1, keepdims=True)
    var = jnp.mean(jnp.square(x - mean), axis=-1, keepdims=True)
    xn = (x - mean) * jax.lax.rsqrt(var + eps)
    o_ref[...] = (xn * g_ref[...] + b_ref[...]).astype(o_ref.dtype)


def layer_norm(x2d, g, b, eps=1e-5, tm=256):
    M, D = x2d.shape
    tm = _pick_tile(M, tm)
    return pl.pallas_call(
        functools.partial(_layernorm_kernel, eps=eps),
        out_shape=jax.ShapeDtypeStruct((M, D), x2d.dtype),
        grid=(M // tm,),
        in_specs=[
            pl.BlockSpec((tm, D), lambda i: (i, 0)),
            pl.BlockSpec((1, D), lambda i: (0, 0)),
            pl.BlockSpec((1, D), lambda i: (0, 0)),
        ],
        out_specs=pl.BlockSpec((tm, D), lambda i: (i, 0)),
        compiler_params=pltpu.CompilerParams(
            dimension_semantics=("parallel",), vmem_limit_bytes=_VMEM_LIMIT),
    )(x2d, g.reshape(1, D), b.reshape(1, D))


# --------------------------------------------------------------------------
# Attention: per-batch grid, heads handled inside the kernel, mask built in-kernel
# --------------------------------------------------------------------------

def _mha_core(q, k, v, bias_row, *, n_heads, causal, scale, out_dtype):
    """q: (Sq, D), k/v: (Sk, D), bias_row: (1, Sk) additive key-padding bias (f32)."""
    Sq, D = q.shape
    Sk = k.shape[0]
    Dh = D // n_heads
    q = q * scale                                   # fold 1/sqrt(Dh) into q
    if causal:
        row = jax.lax.broadcasted_iota(jnp.int32, (Sq, Sk), 0)
        col = jax.lax.broadcasted_iota(jnp.int32, (Sq, Sk), 1)
        causal_bias = jnp.where(row >= col, 0.0, _NEG).astype(jnp.float32)
    outs = []
    for h in range(n_heads):
        sl = slice(h * Dh, (h + 1) * Dh)
        s = jax.lax.dot_general(
            q[:, sl].astype(jnp.bfloat16), k[:, sl].astype(jnp.bfloat16),
            (((1,), (1,)), ((), ())), preferred_element_type=jnp.float32)
        s = s + bias_row
        if causal:
            s = s + causal_bias
        m = jnp.max(s, axis=-1, keepdims=True)
        p = jnp.exp(s - m)
        denom = jnp.sum(p, axis=-1, keepdims=True)
        o = jnp.dot(p.astype(jnp.bfloat16), v[:, sl].astype(jnp.bfloat16),
                    preferred_element_type=jnp.float32)
        outs.append(o * pl.reciprocal(denom, approx=True))
    return jnp.concatenate(outs, axis=-1).astype(out_dtype)


def _self_attn_kernel(qkv_ref, bias_ref, o_ref, *, n_heads, causal, scale):
    qkv = qkv_ref[0].astype(jnp.float32)            # (S, 3D)
    D = qkv.shape[-1] // 3
    o_ref[0] = _mha_core(qkv[:, :D], qkv[:, D:2 * D], qkv[:, 2 * D:], bias_ref[0],
                         n_heads=n_heads, causal=causal, scale=scale,
                         out_dtype=o_ref.dtype)


def _cross_attn_kernel(q_ref, kv_ref, bias_ref, o_ref, *, n_heads, scale):
    q = q_ref[0].astype(jnp.float32)                # (Sq, D)
    kv = kv_ref[0].astype(jnp.float32)              # (Sk, 2D)
    D = q.shape[-1]
    o_ref[0] = _mha_core(q, kv[:, :D], kv[:, D:], bias_ref[0],
                         n_heads=n_heads, causal=False, scale=scale,
                         out_dtype=o_ref.dtype)


def self_attention(qkv, pad_bias, n_heads, causal):
    """qkv: (B, S, 3D), pad_bias: (B, 1, S) additive key bias -> (B, S, D)."""
    B, S, D3 = qkv.shape
    D = D3 // 3
    Dh = D // n_heads
    cost = pl.CostEstimate(flops=4 * B * S * S * D,
                           transcendentals=B * n_heads * S * S,
                           bytes_accessed=4 * (B * S * D3 + B * S * D + B * S))
    return pl.pallas_call(
        functools.partial(_self_attn_kernel, n_heads=n_heads, causal=causal,
                          scale=1.0 / float(Dh) ** 0.5),
        out_shape=jax.ShapeDtypeStruct((B, S, D), qkv.dtype),
        grid=(B,),
        in_specs=[
            pl.BlockSpec((1, S, D3), lambda b: (b, 0, 0)),
            pl.BlockSpec((1, 1, S), lambda b: (b, 0, 0)),
        ],
        out_specs=pl.BlockSpec((1, S, D), lambda b: (b, 0, 0)),
        compiler_params=pltpu.CompilerParams(
            dimension_semantics=("parallel",), vmem_limit_bytes=_VMEM_LIMIT),
        cost_estimate=cost,
    )(qkv, pad_bias)


def cross_attention(q, kv, pad_bias, n_heads):
    """q: (B, Sq, D), kv: (B, Sk, 2D), pad_bias: (B, 1, Sk) -> (B, Sq, D)."""
    B, Sq, D = q.shape
    Sk = kv.shape[1]
    Dh = D // n_heads
    cost = pl.CostEstimate(flops=4 * B * Sq * Sk * D,
                           transcendentals=B * n_heads * Sq * Sk,
                           bytes_accessed=4 * (B * Sq * D + B * Sk * 2 * D
                                               + B * Sq * D + B * Sk))
    return pl.pallas_call(
        functools.partial(_cross_attn_kernel, n_heads=n_heads,
                          scale=1.0 / float(Dh) ** 0.5),
        out_shape=jax.ShapeDtypeStruct((B, Sq, D), q.dtype),
        grid=(B,),
        in_specs=[
            pl.BlockSpec((1, Sq, D), lambda b: (b, 0, 0)),
            pl.BlockSpec((1, Sk, 2 * D), lambda b: (b, 0, 0)),
            pl.BlockSpec((1, 1, Sk), lambda b: (b, 0, 0)),
        ],
        out_specs=pl.BlockSpec((1, Sq, D), lambda b: (b, 0, 0)),
        compiler_params=pltpu.CompilerParams(
            dimension_semantics=("parallel",), vmem_limit_bytes=_VMEM_LIMIT),
        cost_estimate=cost,
    )(q, kv, pad_bias)


# --------------------------------------------------------------------------
# BART blocks (activations kept 2-D (B*S, D); reshape to 3-D only for attention)
# --------------------------------------------------------------------------

def encoder_layer(x2, p, pad_bias, n_heads, B, S):
    D = x2.shape[1]
    qkv = linear(x2, p["qkv_w"], p["qkv_b"]).reshape(B, S, 3 * D)
    a = self_attention(qkv, pad_bias, n_heads, causal=False).reshape(B * S, D)
    x2 = linear_res_ln(a, p["o_w"], p["o_b"], x2, p["sa_ln_g"], p["sa_ln_b"])
    h = linear(x2, p["fc1_w"], p["fc1_b"], activation="gelu")
    x2 = linear_res_ln(h, p["fc2_w"], p["fc2_b"], x2, p["final_ln_g"], p["final_ln_b"])
    return x2


def decoder_layer(y2, enc2, p, enc_pad_bias, zero_bias, n_heads, B, S, S_enc):
    D = y2.shape[1]
    # causal self-attention
    qkv = linear(y2, p["sa_qkv_w"], p["sa_qkv_b"]).reshape(B, S, 3 * D)
    a = self_attention(qkv, zero_bias, n_heads, causal=True).reshape(B * S, D)
    y2 = linear_res_ln(a, p["sa_o_w"], p["sa_o_b"], y2, p["sa_ln_g"], p["sa_ln_b"])
    # cross-attention over encoder output (fused KV projection)
    q = linear(y2, p["ca_q_w"], p["ca_q_b"]).reshape(B, S, D)
    kv = linear(enc2, p["ca_kv_w"], p["ca_kv_b"]).reshape(B, S_enc, 2 * D)
    a = cross_attention(q, kv, enc_pad_bias, n_heads).reshape(B * S, D)
    y2 = linear_res_ln(a, p["ca_o_w"], p["ca_o_b"], y2, p["ca_ln_g"], p["ca_ln_b"])
    # FFN
    h = linear(y2, p["fc1_w"], p["fc1_b"], activation="gelu")
    y2 = linear_res_ln(h, p["fc2_w"], p["fc2_b"], y2, p["final_ln_g"], p["final_ln_b"])
    return y2


def bart_forward(params, input_ids, attention_mask, *, cfg):
    """Equivalent of BART_encoder.forward: returns (mlm_logits, last_decoder_hidden)."""
    B, S = input_ids.shape
    D, H, V = cfg["d_model"], cfg["n_heads"], cfg["vocab_size"]

    pos = jnp.arange(S) + 2  # BartLearnedPositionalEmbedding offset = 2
    # tiny (B, 1, S) additive key-padding bias (never materialized per-head)
    enc_pad_bias = ((1.0 - attention_mask.astype(jnp.float32)) * _NEG).reshape(B, 1, S)
    zero_bias = jnp.zeros((B, 1, S), jnp.float32)

    # ---- encoder ----
    # TODO(synk): embedding gathers stay as XLA ops (data-dependent row gather).
    x = jnp.take(params["shared_emb"], input_ids, axis=0) * cfg["embed_scale"]
    x = x + jnp.take(params["enc_pos_emb"], pos, axis=0)[None]
    x2 = layer_norm(x.reshape(B * S, D), params["enc_ln_emb_g"], params["enc_ln_emb_b"])
    for lp in params["enc_layers"]:
        x2 = encoder_layer(x2, lp, enc_pad_bias, H, B, S)
    enc2 = x2  # (B*S, D)

    # ---- decoder (decoder_input_ids = shift_tokens_right) ----
    dec_ids = jnp.concatenate(
        [jnp.full((B, 1), cfg["decoder_start_token_id"], dtype=input_ids.dtype),
         input_ids[:, :-1]], axis=1)
    y = jnp.take(params["shared_emb"], dec_ids, axis=0) * cfg["embed_scale"]
    y = y + jnp.take(params["dec_pos_emb"], pos, axis=0)[None]
    y2 = layer_norm(y.reshape(B * S, D), params["dec_ln_emb_g"], params["dec_ln_emb_b"])
    for lp in params["dec_layers"]:
        y2 = decoder_layer(y2, enc2, lp, enc_pad_bias, zero_bias, H, B, S, S)
    last_hidden = y2.reshape(B, S, D)

    # ---- LM head: tied embeddings + final_logits_bias (vocab-tiled, no .T copy) ----
    logits = lm_head(y2, params["shared_emb"],
                     params["final_logits_bias"]).reshape(B, S, V)
    return logits, last_hidden


# --------------------------------------------------------------------------
# Deterministic parameter init (synthetic, no checkpoint load)
# --------------------------------------------------------------------------

def init_params(key, cfg):
    D, F, V = cfg["d_model"], cfg["ffn_dim"], cfg["vocab_size"]
    keys = iter(jax.random.split(key, 256))

    def nrm(shape):
        return jax.random.normal(next(keys), shape, jnp.float32) * 0.02

    zeros = lambda s: jnp.zeros(s, jnp.float32)
    ones = lambda s: jnp.ones(s, jnp.float32)

    def enc_layer():
        return {"qkv_w": nrm((D, 3 * D)), "qkv_b": zeros((3 * D,)),
                "o_w": nrm((D, D)), "o_b": zeros((D,)),
                "sa_ln_g": ones((D,)), "sa_ln_b": zeros((D,)),
                "fc1_w": nrm((D, F)), "fc1_b": zeros((F,)),
                "fc2_w": nrm((F, D)), "fc2_b": zeros((D,)),
                "final_ln_g": ones((D,)), "final_ln_b": zeros((D,))}

    def dec_layer():
        return {"sa_qkv_w": nrm((D, 3 * D)), "sa_qkv_b": zeros((3 * D,)),
                "sa_o_w": nrm((D, D)), "sa_o_b": zeros((D,)),
                "sa_ln_g": ones((D,)), "sa_ln_b": zeros((D,)),
                "ca_q_w": nrm((D, D)), "ca_q_b": zeros((D,)),
                "ca_kv_w": nrm((D, 2 * D)), "ca_kv_b": zeros((2 * D,)),
                "ca_o_w": nrm((D, D)), "ca_o_b": zeros((D,)),
                "ca_ln_g": ones((D,)), "ca_ln_b": zeros((D,)),
                "fc1_w": nrm((D, F)), "fc1_b": zeros((F,)),
                "fc2_w": nrm((F, D)), "fc2_b": zeros((D,)),
                "final_ln_g": ones((D,)), "final_ln_b": zeros((D,))}

    return {
        "shared_emb": nrm((V, D)),
        "enc_pos_emb": nrm((cfg["max_pos"] + 2, D)),
        "dec_pos_emb": nrm((cfg["max_pos"] + 2, D)),
        "enc_ln_emb_g": ones((D,)), "enc_ln_emb_b": zeros((D,)),
        "dec_ln_emb_g": ones((D,)), "dec_ln_emb_b": zeros((D,)),
        "enc_layers": [enc_layer() for _ in range(cfg["enc_layers"])],
        "dec_layers": [dec_layer() for _ in range(cfg["dec_layers"])],
        "final_logits_bias": zeros((V,)),
    }


# --------------------------------------------------------------------------

if __name__ == "__main__":
    cfg = dict(vocab_size=128, d_model=64, n_heads=2, ffn_dim=128,
               enc_layers=2, dec_layers=2, max_pos=64,
               pad_token_id=1, decoder_start_token_id=2, embed_scale=1.0)

    key = jax.random.PRNGKey(0)
    pkey, ikey = jax.random.split(key)
    params = init_params(pkey, cfg)

    B, S = 2, 8
    input_ids = jax.random.randint(ikey, (B, S), 3, cfg["vocab_size"], dtype=jnp.int32)
    # pad out the last two tokens of the second example
    input_ids = input_ids.at[1, -2:].set(cfg["pad_token_id"])
    attention_mask = jnp.ones((B, S), jnp.int32).at[1, -2:].set(0)

    fwd = jax.jit(functools.partial(bart_forward, cfg=cfg))
    mlm_logits, last_hidden = fwd(params, input_ids, attention_mask)
    jax.block_until_ready((mlm_logits, last_hidden))

    assert mlm_logits.shape == (B, S, cfg["vocab_size"]), mlm_logits.shape
    assert last_hidden.shape == (B, S, cfg["d_model"]), last_hidden.shape
    assert jnp.all(jnp.isfinite(mlm_logits)) and jnp.all(jnp.isfinite(last_hidden))
    print("KERNEL_OK")
</pallas_src>

<mosaic_0001>
module attributes {stable_mosaic.version = 11 : i64} {
  func.func @_layernorm_kernel(%arg0: i32, %arg1: memref<16x64xf32, #tpu.memory_space<vmem>>, %arg2: memref<1x64xf32, #tpu.memory_space<vmem>>, %arg3: memref<1x64xf32, #tpu.memory_space<vmem>>, %arg4: memref<16x64xf32, #tpu.memory_space<vmem>>) attributes {dimension_semantics = [#tpu.dimension_semantics<parallel>], iteration_bounds = array<i64: 1>, scalar_prefetch = 0 : i64, scratch_operands = 0 : i64, tpu.core_type = #tpu.core_type<tc>, window_params = [{transform_indices = @transform_0, window_bounds = array<i64: 16, 64>}, {pipeline_mode = #tpu.pipeline_mode<synchronous>, transform_indices = @transform_1, window_bounds = array<i64: 1, 64>}, {pipeline_mode = #tpu.pipeline_mode<synchronous>, transform_indices = @transform_2, window_bounds = array<i64: 1, 64>}, {transform_indices = @transform_3, window_bounds = array<i64: 16, 64>}]} {
    %c0 = arith.constant 0 : index
    %c0_0 = arith.constant 0 : index
    %0 = vector.load %arg1[%c0, %c0_0] : memref<16x64xf32, #tpu.memory_space<vmem>>, vector<16x64xf32>
    %cst = arith.constant dense<0.000000e+00> : vector<16xf32>
    %1 = vector.multi_reduction <add>, %0, %cst [1] : vector<16x64xf32> to vector<16xf32>
    %2 = vector.shape_cast %1 : vector<16xf32> to vector<16x1xf32>
    %cst_1 = arith.constant 6.400000e+01 : f32
    %3 = vector.broadcast %cst_1 : f32 to vector<16x1xf32>
    %4 = arith.divf %2, %3 : vector<16x1xf32>
    %5 = vector.broadcast %4 : vector<16x1xf32> to vector<16x64xf32>
    %6 = arith.subf %0, %5 : vector<16x64xf32>
    %7 = arith.mulf %6, %6 : vector<16x64xf32>
    %cst_2 = arith.constant dense<0.000000e+00> : vector<16xf32>
    %8 = vector.multi_reduction <add>, %7, %cst_2 [1] : vector<16x64xf32> to vector<16xf32>
    %9 = vector.shape_cast %8 : vector<16xf32> to vector<16x1xf32>
    %cst_3 = arith.constant 6.400000e+01 : f32
    %10 = vector.broadcast %cst_3 : f32 to vector<16x1xf32>
    %11 = arith.divf %9, %10 : vector<16x1xf32>
    %12 = vector.broadcast %4 : vector<16x1xf32> to vector<16x64xf32>
    %13 = arith.subf %0, %12 : vector<16x64xf32>
    %cst_4 = arith.constant 9.99999974E-6 : f32
    %14 = vector.broadcast %cst_4 : f32 to vector<16x1xf32>
    %15 = arith.addf %11, %14 : vector<16x1xf32>
    %16 = math.rsqrt %15 : vector<16x1xf32>
    %17 = vector.broadcast %16 : vector<16x1xf32> to vector<16x64xf32>
    %18 = arith.mulf %13, %17 : vector<16x64xf32>
    %c0_5 = arith.constant 0 : index
    %c0_6 = arith.constant 0 : index
    %19 = vector.load %arg2[%c0_5, %c0_6] : memref<1x64xf32, #tpu.memory_space<vmem>>, vector<1x64xf32>
    %20 = vector.broadcast %19 : vector<1x64xf32> to vector<16x64xf32>
    %21 = arith.mulf %18, %20 : vector<16x64xf32>
    %c0_7 = arith.constant 0 : index
    %c0_8 = arith.constant 0 : index
    %22 = vector.load %arg3[%c0_7, %c0_8] : memref<1x64xf32, #tpu.memory_space<vmem>>, vector<1x64xf32>
    %23 = vector.broadcast %22 : vector<1x64xf32> to vector<16x64xf32>
    %24 = arith.addf %21, %23 : vector<16x64xf32>
    %c0_9 = arith.constant 0 : index
    %c0_10 = arith.constant 0 : index
    %25 = vector.load %arg4[%c0_9, %c0_10] : memref<16x64xf32, #tpu.memory_space<vmem>>, vector<16x64xf32>
    tpu.vector_store %arg4[%c0_9, %c0_10], %24 {strides = array<i32>} : memref<16x64xf32, #tpu.memory_space<vmem>>, vector<16x64xf32>,
    return
  }
  func.func @transform_0(%arg0: i32) -> (i32, i32) {
    %c0_i32 = arith.constant 0 : i32
    %c0_i32_0 = arith.constant 0 : i32
    return %arg0, %c0_i32 : i32, i32
  }
  func.func @transform_1(%arg0: i32) -> (i32, i32) {
    %c0_i32 = arith.constant 0 : i32
    %c0_i32_0 = arith.constant 0 : i32
    %c0_i32_1 = arith.constant 0 : i32
    return %c0_i32, %c0_i32_0 : i32, i32
  }
  func.func @transform_2(%arg0: i32) -> (i32, i32) {
    %c0_i32 = arith.constant 0 : i32
    %c0_i32_0 = arith.constant 0 : i32
    %c0_i32_1 = arith.constant 0 : i32
    return %c0_i32, %c0_i32_0 : i32, i32
  }
  func.func @transform_3(%arg0: i32) -> (i32, i32) {
    %c0_i32 = arith.constant 0 : i32
    %c0_i32_0 = arith.constant 0 : i32
    return %arg0, %c0_i32 : i32, i32
  }
}

module attributes {stable_mosaic.version = 11 : i64} {
  func.func @_linear_kernel(%arg0: i32, %arg1: i32, %arg2: i32, %arg3: memref<16x64xf32, #tpu.memory_space<vmem>>, %arg4: memref<64x192xf32, #tpu.memory_space<vmem>>, %arg5: memref<1x192xf32, #tpu.memory_space<vmem>>, %arg6: memref<16x192xf32, #tpu.memory_space<vmem>>, %arg7: memref<16x192xf32, #tpu.memory_space<vmem>>) attributes {dimension_semantics = [#tpu.dimension_semantics<parallel>, #tpu.dimension_semantics<parallel>, #tpu.dimension_semantics<arbitrary>], iteration_bounds = array<i64: 1, 1, 1>, scalar_prefetch = 0 : i64, scratch_operands = 1 : i64, tpu.core_type = #tpu.core_type<tc>, window_params = [{transform_indices = @transform_0, window_bounds = array<i64: 16, 64>}, {transform_indices = @transform_1, window_bounds = array<i64: 64, 192>}, {transform_indices = @transform_2, window_bounds = array<i64: 1, 192>}, {transform_indices = @transform_3, window_bounds = array<i64: 16, 192>}]} {
    %c0_i32 = arith.constant 0 : i32
    %0 = arith.cmpi eq, %arg2, %c0_i32 : i32
    %1 = arith.extui %0 : i1 to i32
    %c0_i32_0 = arith.constant 0 : i32
    %2 = arith.cmpi ne, %1, %c0_i32_0 : i32
    scf.if %2 {
      %cst_10 = arith.constant 0.000000e+00 : f32
      %14 = vector.broadcast %cst_10 : f32 to vector<16x192xf32>
      %c0_11 = arith.constant 0 : index
      %c0_12 = arith.constant 0 : index
      %15 = vector.load %arg7[%c0_11, %c0_12] : memref<16x192xf32, #tpu.memory_space<vmem>>, vector<16x192xf32>
      tpu.vector_store %arg7[%c0_11, %c0_12], %14 {strides = array<i32>} : memref<16x192xf32, #tpu.memory_space<vmem>>, vector<16x192xf32>,
    } else {
    }
    %c0 = arith.constant 0 : index
    %c0_1 = arith.constant 0 : index
    %3 = vector.load %arg7[%c0, %c0_1] : memref<16x192xf32, #tpu.memory_space<vmem>>, vector<16x192xf32>
    %c0_2 = arith.constant 0 : index
    %c0_3 = arith.constant 0 : index
    %4 = vector.load %arg3[%c0_2, %c0_3] : memref<16x64xf32, #tpu.memory_space<vmem>>, vector<16x64xf32>
    %5 = arith.truncf %4 : vector<16x64xf32> to vector<16x64xbf16>
    %c0_4 = arith.constant 0 : index
    %c0_5 = arith.constant 0 : index
    %6 = vector.load %arg4[%c0_4, %c0_5] : memref<64x192xf32, #tpu.memory_space<vmem>>, vector<64x192xf32>
    %7 = arith.truncf %6 : vector<64x192xf32> to vector<64x192xbf16>
    %cst = arith.constant dense<0.000000e+00> : vector<16x192xf32>
    %8 = tpu.matmul %5, %7, %cst {dimension_numbers = #tpu.dot_dimension_numbers<[1], [0], [0], [1], [0, 0, 1, 1], [], []>} : vector<16x64xbf16>, vector<64x192xbf16>, vector<16x192xf32> -> vector<16x192xf32>
    %9 = arith.addf %3, %8 : vector<16x192xf32>
    %c0_6 = arith.constant 0 : index
    %c0_7 = arith.constant 0 : index
    %10 = vector.load %arg7[%c0_6, %c0_7] : memref<16x192xf32, #tpu.memory_space<vmem>>, vector<16x192xf32>
    tpu.vector_store %arg7[%c0_6, %c0_7], %9 {strides = array<i32>} : memref<16x192xf32, #tpu.memory_space<vmem>>, vector<16x192xf32>,
    %c0_i32_8 = arith.constant 0 : i32
    %11 = arith.cmpi eq, %arg2, %c0_i32_8 : i32
    %12 = arith.extui %11 : i1 to i32
    %c0_i32_9 = arith.constant 0 : i32
    %13 = arith.cmpi ne, %12, %c0_i32_9 : i32
    scf.if %13 {
      %c0_10 = arith.constant 0 : index
      %c0_11 = arith.constant 0 : index
      %14 = vector.load %arg7[%c0_10, %c0_11] : memref<16x192xf32, #tpu.memory_space<vmem>>, vector<16x192xf32>
      %c0_12 = arith.constant 0 : index
      %c0_13 = arith.constant 0 : index
      %15 = vector.load %arg5[%c0_12, %c0_13] : memref<1x192xf32, #tpu.memory_space<vmem>>, vector<1x192xf32>
      %16 = vector.broadcast %15 : vector<1x192xf32> to vector<16x192xf32>
      %17 = arith.addf %14, %16 : vector<16x192xf32>
      %c0_14 = arith.constant 0 : index
      %c0_15 = arith.constant 0 : index
      %18 = vector.load %arg6[%c0_14, %c0_15] : memref<16x192xf32, #tpu.memory_space<vmem>>, vector<16x192xf32>
      tpu.vector_store %arg6[%c0_14, %c0_15], %17 {strides = array<i32>} : memref<16x192xf32, #tpu.memory_space<vmem>>, vector<16x192xf32>,
    } else {
    }
    return
  }
  func.func @transform_0(%arg0: i32, %arg1: i32, %arg2: i32) -> (i32, i32) {
    %c0_i32 = arith.constant 0 : i32
    return %arg0, %arg2 : i32, i32
  }
  func.func @transform_1(%arg0: i32, %arg1: i32, %arg2: i32) -> (i32, i32) {
    %c0_i32 = arith.constant 0 : i32
    return %arg2, %arg1 : i32, i32
  }
  func.func @transform_2(%arg0: i32, %arg1: i32, %arg2: i32) -> (i32, i32) {
    %c0_i32 = arith.constant 0 : i32
    %c0_i32_0 = arith.constant 0 : i32
    return %c0_i32, %arg1 : i32, i32
  }
  func.func @transform_3(%arg0: i32, %arg1: i32, %arg2: i32) -> (i32, i32) {
    %c0_i32 = arith.constant 0 : i32
    return %arg0, %arg1 : i32, i32
  }
}

module attributes {stable_mosaic.version = 11 : i64} {
  func.func @_linear_res_ln_kernel(%arg0: i32, %arg1: i32, %arg2: i32, %arg3: memref<16x64xf32, #tpu.memory_space<vmem>>, %arg4: memref<64x64xf32, #tpu.memory_space<vmem>>, %arg5: memref<1x64xf32, #tpu.memory_space<vmem>>, %arg6: memref<16x64xf32, #tpu.memory_space<vmem>>, %arg7: memref<1x64xf32, #tpu.memory_space<vmem>>, %arg8: memref<1x64xf32, #tpu.memory_space<vmem>>, %arg9: memref<16x64xf32, #tpu.memory_space<vmem>>, %arg10: memref<16x64xf32, #tpu.memory_space<vmem>>) attributes {dimension_semantics = [#tpu.dimension_semantics<parallel>, #tpu.dimension_semantics<parallel>, #tpu.dimension_semantics<arbitrary>], iteration_bounds = array<i64: 1, 1, 1>, scalar_prefetch = 0 : i64, scratch_operands = 1 : i64, tpu.core_type = #tpu.core_type<tc>, window_params = [{transform_indices = @transform_0, window_bounds = array<i64: 16, 64>}, {transform_indices = @transform_1, window_bounds = array<i64: 64, 64>}, {pipeline_mode = #tpu.pipeline_mode<synchronous>, transform_indices = @transform_2, window_bounds = array<i64: 1, 64>}, {transform_indices = @transform_3, window_bounds = array<i64: 16, 64>}, {pipeline_mode = #tpu.pipeline_mode<synchronous>, transform_indices = @transform_4, window_bounds = array<i64: 1, 64>}, {pipeline_mode = #tpu.pipeline_mode<synchronous>, transform_indices = @transform_5, window_bounds = array<i64: 1, 64>}, {transform_indices = @transform_6, window_bounds = array<i64: 16, 64>}]} {
    %c0_i32 = arith.constant 0 : i32
    %0 = arith.cmpi eq, %arg2, %c0_i32 : i32
    %1 = arith.extui %0 : i1 to i32
    %c0_i32_0 = arith.constant 0 : i32
    %2 = arith.cmpi ne, %1, %c0_i32_0 : i32
    scf.if %2 {
      %cst_10 = arith.constant 0.000000e+00 : f32
      %14 = vector.broadcast %cst_10 : f32 to vector<16x64xf32>
      %c0_11 = arith.constant 0 : index
      %c0_12 = arith.constant 0 : index
      %15 = vector.load %arg10[%c0_11, %c0_12] : memref<16x64xf32, #tpu.memory_space<vmem>>, vector<16x64xf32>
      tpu.vector_store %arg10[%c0_11, %c0_12], %14 {strides = array<i32>} : memref<16x64xf32, #tpu.memory_space<vmem>>, vector<16x64xf32>,
    } else {
    }
    %c0 = arith.constant 0 : index
    %c0_1 = arith.constant 0 : index
    %3 = vector.load %arg10[%c0, %c0_1] : memref<16x64xf32, #tpu.memory_space<vmem>>, vector<16x64xf32>
    %c0_2 = arith.constant 0 : index
    %c0_3 = arith.constant 0 : index
    %4 = vector.load %arg3[%c0_2, %c0_3] : memref<16x64xf32, #tpu.memory_space<vmem>>, vector<16x64xf32>
    %5 = arith.truncf %4 : vector<16x64xf32> to vector<16x64xbf16>
    %c0_4 = arith.constant 0 : index
    %c0_5 = arith.constant 0 : index
    %6 = vector.load %arg4[%c0_4, %c0_5] : memref<64x64xf32, #tpu.memory_space<vmem>>, vector<64x64xf32>
    %7 = arith.truncf %6 : vector<64x64xf32> to vector<64x64xbf16>
    %cst = arith.constant dense<0.000000e+00> : vector<16x64xf32>
    %8 = tpu.matmul %5, %7, %cst {dimension_numbers = #tpu.dot_dimension_numbers<[1], [0], [0], [1], [0, 0, 1, 1], [], []>} : vector<16x64xbf16>, vector<64x64xbf16>, vector<16x64xf32> -> vector<16x64xf32>
    %9 = arith.addf %3, %8 : vector<16x64xf32>
    %c0_6 = arith.constant 0 : index
    %c0_7 = arith.constant 0 : index
    %10 = vector.load %arg10[%c0_6, %c0_7] : memref<16x64xf32, #tpu.memory_space<vmem>>, vector<16x64xf32>
    tpu.vector_store %arg10[%c0_6, %c0_7], %9 {strides = array<i32>} : memref<16x64xf32, #tpu.memory_space<vmem>>, vector<16x64xf32>,
    %c0_i32_8 = arith.constant 0 : i32
    %11 = arith.cmpi eq, %arg2, %c0_i32_8 : i32
    %12 = arith.extui %11 : i1 to i32
    %c0_i32_9 = arith.constant 0 : i32
    %13 = arith.cmpi ne, %12, %c0_i32_9 : i32
    scf.if %13 {
      %c0_10 = arith.constant 0 : index
      %c0_11 = arith.constant 0 : index
      %14 = vector.load %arg10[%c0_10, %c0_11] : memref<16x64xf32, #tpu.memory_space<vmem>>, vector<16x64xf32>
      %c0_12 = arith.constant 0 : index
      %c0_13 = arith.constant 0 : index
      %15 = vector.load %arg5[%c0_12, %c0_13] : memref<1x64xf32, #tpu.memory_space<vmem>>, vector<1x64xf32>
      %16 = vector.broadcast %15 : vector<1x64xf32> to vector<16x64xf32>
      %17 = arith.addf %14, %16 : vector<16x64xf32>
      %c0_14 = arith.constant 0 : index
      %c0_15 = arith.constant 0 : index
      %18 = vector.load %arg6[%c0_14, %c0_15] : memref<16x64xf32, #tpu.memory_space<vmem>>, vector<16x64xf32>
      %19 = arith.addf %17, %18 : vector<16x64xf32>
      %cst_16 = arith.constant dense<0.000000e+00> : vector<16xf32>
      %20 = vector.multi_reduction <add>, %19, %cst_16 [1] : vector<16x64xf32> to vector<16xf32>
      %21 = vector.shape_cast %20 : vector<16xf32> to vector<16x1xf32>
      %cst_17 = arith.constant 6.400000e+01 : f32
      %22 = vector.broadcast %cst_17 : f32 to vector<16x1xf32>
      %23 = arith.divf %21, %22 : vector<16x1xf32>
      %24 = vector.broadcast %23 : vector<16x1xf32> to vector<16x64xf32>
      %25 = arith.subf %19, %24 : vector<16x64xf32>
      %26 = arith.mulf %25, %25 : vector<16x64xf32>
      %cst_18 = arith.constant dense<0.000000e+00> : vector<16xf32>
      %27 = vector.multi_reduction <add>, %26, %cst_18 [1] : vector<16x64xf32> to vector<16xf32>
      %28 = vector.shape_cast %27 : vector<16xf32> to vector<16x1xf32>
      %cst_19 = arith.constant 6.400000e+01 : f32
      %29 = vector.broadcast %cst_19 : f32 to vector<16x1xf32>
      %30 = arith.divf %28, %29 : vector<16x1xf32>
      %31 = vector.broadcast %23 : vector<16x1xf32> to vector<16x64xf32>
      %32 = arith.subf %19, %31 : vector<16x64xf32>
      %cst_20 = arith.constant 9.99999974E-6 : f32
      %33 = vector.broadcast %cst_20 : f32 to vector<16x1xf32>
      %34 = arith.addf %30, %33 : vector<16x1xf32>
      %35 = math.rsqrt %34 : vector<16x1xf32>
      %36 = vector.broadcast %35 : vector<16x1xf32> to vector<16x64xf32>
      %37 = arith.mulf %32, %36 : vector<16x64xf32>
      %c0_21 = arith.constant 0 : index
      %c0_22 = arith.constant 0 : index
      %38 = vector.load %arg7[%c0_21, %c0_22] : memref<1x64xf32, #tpu.memory_space<vmem>>, vector<1x64xf32>
      %39 = vector.broadcast %38 : vector<1x64xf32> to vector<16x64xf32>
      %40 = arith.mulf %37, %39 : vector<16x64xf32>
      %c0_23 = arith.constant 0 : index
      %c0_24 = arith.constant 0 : index
      %41 = vector.load %arg8[%c0_23, %c0_24] : memref<1x64xf32, #tpu.memory_space<vmem>>, vector<1x64xf32>
      %42 = vector.broadcast %41 : vector<1x64xf32> to vector<16x64xf32>
      %43 = arith.addf %40, %42 : vector<16x64xf32>
      %c0_25 = arith.constant 0 : index
      %c0_26 = arith.constant 0 : index
      %44 = vector.load %arg9[%c0_25, %c0_26] : memref<16x64xf32, #tpu.memory_space<vmem>>, vector<16x64xf32>
      tpu.vector_store %arg9[%c0_25, %c0_26], %43 {strides = array<i32>} : memref<16x64xf32, #tpu.memory_space<vmem>>, vector<16x64xf32>,
    } else {
    }
    return
  }
  func.func @transform_0(%arg0: i32, %arg1: i32, %arg2: i32) -> (i32, i32) {
    %c0_i32 = arith.constant 0 : i32
    return %arg0, %arg2 : i32, i32
  }
  func.func @transform_1(%arg0: i32, %arg1: i32, %arg2: i32) -> (i32, i32) {
    %c0_i32 = arith.constant 0 : i32
    %c0_i32_0 = arith.constant 0 : i32
    return %arg2, %c0_i32 : i32, i32
  }
  func.func @transform_2(%arg0: i32, %arg1: i32, %arg2: i32) -> (i32, i32) {
    %c0_i32 = arith.constant 0 : i32
    %c0_i32_0 = arith.constant 0 : i32
    %c0_i32_1 = arith.constant 0 : i32
    return %c0_i32, %c0_i32_0 : i32, i32
  }
  func.func @transform_3(%arg0: i32, %arg1: i32, %arg2: i32) -> (i32, i32) {
    %c0_i32 = arith.constant 0 : i32
    %c0_i32_0 = arith.constant 0 : i32
    return %arg0, %c0_i32 : i32, i32
  }
  func.func @transform_4(%arg0: i32, %arg1: i32, %arg2: i32) -> (i32, i32) {
    %c0_i32 = arith.constant 0 : i32
    %c0_i32_0 = arith.constant 0 : i32
    %c0_i32_1 = arith.constant 0 : i32
    return %c0_i32, %c0_i32_0 : i32, i32
  }
  func.func @transform_5(%arg0: i32, %arg1: i32, %arg2: i32) -> (i32, i32) {
    %c0_i32 = arith.constant 0 : i32
    %c0_i32_0 = arith.constant 0 : i32
    %c0_i32_1 = arith.constant 0 : i32
    return %c0_i32, %c0_i32_0 : i32, i32
  }
  func.func @transform_6(%arg0: i32, %arg1: i32, %arg2: i32) -> (i32, i32) {
    %c0_i32 = arith.constant 0 : i32
    %c0_i32_0 = arith.constant 0 : i32
    return %arg0, %c0_i32 : i32, i32
  }
}

module attributes {stable_mosaic.version = 11 : i64} {
  func.func @_self_attn_kernel(%arg0: i32, %arg1: memref<1x8x192xf32, #tpu.memory_space<vmem>>, %arg2: memref<1x1x8xf32, #tpu.memory_space<vmem>>, %arg3: memref<1x8x64xf32, #tpu.memory_space<vmem>>) attributes {dimension_semantics = [#tpu.dimension_semantics<parallel>], iteration_bounds = array<i64: 2>, scalar_prefetch = 0 : i64, scratch_operands = 0 : i64, tpu.core_type = #tpu.core_type<tc>, window_params = [{transform_indices = @transform_0, window_bounds = array<i64: 1, 8, 192>}, {transform_indices = @transform_1, window_bounds = array<i64: 1, 1, 8>}, {transform_indices = @transform_2, window_bounds = array<i64: 1, 8, 64>}]} {
    %c0 = arith.constant 0 : index
    %c0_0 = arith.constant 0 : index
    %c0_1 = arith.constant 0 : index
    %0 = vector.load %arg1[%c0, %c0_0, %c0_1] : memref<1x8x192xf32, #tpu.memory_space<vmem>>, vector<1x8x192xf32>
    %1 = vector.shape_cast %0 : vector<1x8x192xf32> to vector<8x192xf32>
    %2 = vector.extract_strided_slice %1 {offsets = [0, 0], sizes = [8, 64], strides = [1, 1]} : vector<8x192xf32> to vector<8x64xf32>
    %3 = vector.extract_strided_slice %1 {offsets = [0, 64], sizes = [8, 64], strides = [1, 1]} : vector<8x192xf32> to vector<8x64xf32>
    %4 = vector.extract_strided_slice %1 {offsets = [0, 128], sizes = [8, 64], strides = [1, 1]} : vector<8x192xf32> to vector<8x64xf32>
    %c0_2 = arith.constant 0 : index
    %c0_3 = arith.constant 0 : index
    %c0_4 = arith.constant 0 : index
    %5 = vector.load %arg2[%c0_2, %c0_3, %c0_4] : memref<1x1x8xf32, #tpu.memory_space<vmem>>, vector<1x1x8xf32>
    %6 = vector.shape_cast %5 : vector<1x1x8xf32> to vector<1x8xf32>
    %cst = arith.constant 0.176776692 : f32
    %7 = vector.broadcast %cst : f32 to vector<8x64xf32>
    %8 = arith.mulf %2, %7 : vector<8x64xf32>
    %9 = vector.extract_strided_slice %8 {offsets = [0, 0], sizes = [8, 32], strides = [1, 1]} : vector<8x64xf32> to vector<8x32xf32>
    %10 = arith.truncf %9 : vector<8x32xf32> to vector<8x32xbf16>
    %11 = vector.extract_strided_slice %3 {offsets = [0, 0], sizes = [8, 32], strides = [1, 1]} : vector<8x64xf32> to vector<8x32xf32>
    %12 = arith.truncf %11 : vector<8x32xf32> to vector<8x32xbf16>
    %cst_5 = arith.constant dense<0.000000e+00> : vector<8x8xf32>
    %13 = tpu.matmul %10, %12, %cst_5 {dimension_numbers = #tpu.dot_dimension_numbers<[1], [1], [0], [0], [0, 0, 1, 0], [], []>} : vector<8x32xbf16>, vector<8x32xbf16>, vector<8x8xf32> -> vector<8x8xf32>
    %14 = vector.broadcast %6 : vector<1x8xf32> to vector<8x8xf32>
    %15 = arith.addf %13, %14 : vector<8x8xf32>
    %cst_6 = arith.constant dense<0xFF800000> : vector<8xf32>
    %16 = vector.multi_reduction <maximumf>, %15, %cst_6 [1] : vector<8x8xf32> to vector<8xf32>
    %17 = vector.shape_cast %16 : vector<8xf32> to vector<8x1xf32>
    %18 = vector.broadcast %17 : vector<8x1xf32> to vector<8x8xf32>
    %19 = arith.subf %15, %18 : vector<8x8xf32>
    %20 = math.exp %19 : vector<8x8xf32>
    %cst_7 = arith.constant dense<0.000000e+00> : vector<8xf32>
    %21 = vector.multi_reduction <add>, %20, %cst_7 [1] : vector<8x8xf32> to vector<8xf32>
    %22 = vector.shape_cast %21 : vector<8xf32> to vector<8x1xf32>
    %23 = arith.truncf %20 : vector<8x8xf32> to vector<8x8xbf16>
    %24 = vector.extract_strided_slice %4 {offsets = [0, 0], sizes = [8, 32], strides = [1, 1]} : vector<8x64xf32> to vector<8x32xf32>
    %25 = arith.truncf %24 : vector<8x32xf32> to vector<8x32xbf16>
    %cst_8 = arith.constant dense<0.000000e+00> : vector<8x32xf32>
    %26 = tpu.matmul %23, %25, %cst_8 {dimension_numbers = #tpu.dot_dimension_numbers<[1], [0], [0], [1], [0, 0, 1, 1], [], []>} : vector<8x8xbf16>, vector<8x32xbf16>, vector<8x32xf32> -> vector<8x32xf32>
    %27 = tpu.reciprocal %22 {approx = true} : vector<8x1xf32> -> vector<8x1xf32>
    %28 = vector.broadcast %27 : vector<8x1xf32> to vector<8x32xf32>
    %29 = arith.mulf %26, %28 : vector<8x32xf32>
    %30 = vector.extract_strided_slice %8 {offsets = [0, 32], sizes = [8, 32], strides = [1, 1]} : vector<8x64xf32> to vector<8x32xf32>
    %31 = arith.truncf %30 : vector<8x32xf32> to vector<8x32xbf16>
    %32 = vector.extract_strided_slice %3 {offsets = [0, 32], sizes = [8, 32], strides = [1, 1]} : vector<8x64xf32> to vector<8x32xf32>
    %33 = arith.truncf %32 : vector<8x32xf32> to vector<8x32xbf16>
    %cst_9 = arith.constant dense<0.000000e+00> : vector<8x8xf32>
    %34 = tpu.matmul %31, %33, %cst_9 {dimension_numbers = #tpu.dot_dimension_numbers<[1], [1], [0], [0], [0, 0, 1, 0], [], []>} : vector<8x32xbf16>, vector<8x32xbf16>, vector<8x8xf32> -> vector<8x8xf32>
    %35 = vector.broadcast %6 : vector<1x8xf32> to vector<8x8xf32>
    %36 = arith.addf %34, %35 : vector<8x8xf32>
    %cst_10 = arith.constant dense<0xFF800000> : vector<8xf32>
    %37 = vector.multi_reduction <maximumf>, %36, %cst_10 [1] : vector<8x8xf32> to vector<8xf32>
    %38 = vector.shape_cast %37 : vector<8xf32> to vector<8x1xf32>
    %39 = vector.broadcast %38 : vector<8x1xf32> to vector<8x8xf32>
    %40 = arith.subf %36, %39 : vector<8x8xf32>
    %41 = math.exp %40 : vector<8x8xf32>
    %cst_11 = arith.constant dense<0.000000e+00> : vector<8xf32>
    %42 = vector.multi_reduction <add>, %41, %cst_11 [1] : vector<8x8xf32> to vector<8xf32>
    %43 = vector.shape_cast %42 : vector<8xf32> to vector<8x1xf32>
    %44 = arith.truncf %41 : vector<8x8xf32> to vector<8x8xbf16>
    %45 = vector.extract_strided_slice %4 {offsets = [0, 32], sizes = [8, 32], strides = [1, 1]} : vector<8x64xf32> to vector<8x32xf32>
    %46 = arith.truncf %45 : vector<8x32xf32> to vector<8x32xbf16>
    %cst_12 = arith.constant dense<0.000000e+00> : vector<8x32xf32>
    %47 = tpu.matmul %44, %46, %cst_12 {dimension_numbers = #tpu.dot_dimension_numbers<[1], [0], [0], [1], [0, 0, 1, 1], [], []>} : vector<8x8xbf16>, vector<8x32xbf16>, vector<8x32xf32> -> vector<8x32xf32>
    %48 = tpu.reciprocal %43 {approx = true} : vector<8x1xf32> -> vector<8x1xf32>
    %49 = vector.broadcast %48 : vector<8x1xf32> to vector<8x32xf32>
    %50 = arith.mulf %47, %49 : vector<8x32xf32>
    %51 = tpu.concatenate %29, %50 in 1 : vector<8x32xf32>, vector<8x32xf32> -> vector<8x64xf32>
    %c0_13 = arith.constant 0 : index
    %c0_14 = arith.constant 0 : index
    %c0_15 = arith.constant 0 : index
    %52 = vector.load %arg3[%c0_13, %c0_14, %c0_15] : memref<1x8x64xf32, #tpu.memory_space<vmem>>, vector<1x8x64xf32>
    %53 = vector.shape_cast %52 : vector<1x8x64xf32> to vector<8x64xf32>
    %54 = vector.shape_cast %51 : vector<8x64xf32> to vector<1x8x64xf32>
    tpu.vector_store %arg3[%c0_13, %c0_14, %c0_15], %54 {strides = array<i32>} : memref<1x8x64xf32, #tpu.memory_space<vmem>>, vector<1x8x64xf32>,
    return
  }
  func.func @transform_0(%arg0: i32) -> (i32, i32, i32) {
    %c0_i32 = arith.constant 0 : i32
    %c0_i32_0 = arith.constant 0 : i32
    %c0_i32_1 = arith.constant 0 : i32
    return %arg0, %c0_i32, %c0_i32_0 : i32, i32, i32
  }
  func.func @transform_1(%arg0: i32) -> (i32, i32, i32) {
    %c0_i32 = arith.constant 0 : i32
    %c0_i32_0 = arith.constant 0 : i32
    %c0_i32_1 = arith.constant 0 : i32
    return %arg0, %c0_i32, %c0_i32_0 : i32, i32, i32
  }
  func.func @transform_2(%arg0: i32) -> (i32, i32, i32) {
    %c0_i32 = arith.constant 0 : i32
    %c0_i32_0 = arith.constant 0 : i32
    %c0_i32_1 = arith.constant 0 : i32
    return %arg0, %c0_i32, %c0_i32_0 : i32, i32, i32
  }
}

module attributes {stable_mosaic.version = 11 : i64} {
  func.func @_linear_kernel(%arg0: i32, %arg1: i32, %arg2: i32, %arg3: memref<16x64xf32, #tpu.memory_space<vmem>>, %arg4: memref<64x128xf32, #tpu.memory_space<vmem>>, %arg5: memref<1x128xf32, #tpu.memory_space<vmem>>, %arg6: memref<16x128xf32, #tpu.memory_space<vmem>>, %arg7: memref<16x128xf32, #tpu.memory_space<vmem>>) attributes {dimension_semantics = [#tpu.dimension_semantics<parallel>, #tpu.dimension_semantics<parallel>, #tpu.dimension_semantics<arbitrary>], iteration_bounds = array<i64: 1, 1, 1>, scalar_prefetch = 0 : i64, scratch_operands = 1 : i64, tpu.core_type = #tpu.core_type<tc>, window_params = [{transform_indices = @transform_0, window_bounds = array<i64: 16, 64>}, {transform_indices = @transform_1, window_bounds = array<i64: 64, 128>}, {transform_indices = @transform_2, window_bounds = array<i64: 1, 128>}, {transform_indices = @transform_3, window_bounds = array<i64: 16, 128>}]} {
    %c0_i32 = arith.constant 0 : i32
    %0 = arith.cmpi eq, %arg2, %c0_i32 : i32
    %1 = arith.extui %0 : i1 to i32
    %c0_i32_0 = arith.constant 0 : i32
    %2 = arith.cmpi ne, %1, %c0_i32_0 : i32
    scf.if %2 {
      %cst_10 = arith.constant 0.000000e+00 : f32
      %14 = vector.broadcast %cst_10 : f32 to vector<16x128xf32>
      %c0_11 = arith.constant 0 : index
      %c0_12 = arith.constant 0 : index
      %15 = vector.load %arg7[%c0_11, %c0_12] : memref<16x128xf32, #tpu.memory_space<vmem>>, vector<16x128xf32>
      tpu.vector_store %arg7[%c0_11, %c0_12], %14 {strides = array<i32>} : memref<16x128xf32, #tpu.memory_space<vmem>>, vector<16x128xf32>,
    } else {
    }
    %c0 = arith.constant 0 : index
    %c0_1 = arith.constant 0 : index
    %3 = vector.load %arg7[%c0, %c0_1] : memref<16x128xf32, #tpu.memory_space<vmem>>, vector<16x128xf32>
    %c0_2 = arith.constant 0 : index
    %c0_3 = arith.constant 0 : index
    %4 = vector.load %arg3[%c0_2, %c0_3] : memref<16x64xf32, #tpu.memory_space<vmem>>, vector<16x64xf32>
    %5 = arith.truncf %4 : vector<16x64xf32> to vector<16x64xbf16>
    %c0_4 = arith.constant 0 : index
    %c0_5 = arith.constant 0 : index
    %6 = vector.load %arg4[%c0_4, %c0_5] : memref<64x128xf32, #tpu.memory_space<vmem>>, vector<64x128xf32>
    %7 = arith.truncf %6 : vector<64x128xf32> to vector<64x128xbf16>
    %cst = arith.constant dense<0.000000e+00> : vector<16x128xf32>
    %8 = tpu.matmul %5, %7, %cst {dimension_numbers = #tpu.dot_dimension_numbers<[1], [0], [0], [1], [0, 0, 1, 1], [], []>} : vector<16x64xbf16>, vector<64x128xbf16>, vector<16x128xf32> -> vector<16x128xf32>
    %9 = arith.addf %3, %8 : vector<16x128xf32>
    %c0_6 = arith.constant 0 : index
    %c0_7 = arith.constant 0 : index
    %10 = vector.load %arg7[%c0_6, %c0_7] : memref<16x128xf32, #tpu.memory_space<vmem>>, vector<16x128xf32>
    tpu.vector_store %arg7[%c0_6, %c0_7], %9 {strides = array<i32>} : memref<16x128xf32, #tpu.memory_space<vmem>>, vector<16x128xf32>,
    %c0_i32_8 = arith.constant 0 : i32
    %11 = arith.cmpi eq, %arg2, %c0_i32_8 : i32
    %12 = arith.extui %11 : i1 to i32
    %c0_i32_9 = arith.constant 0 : i32
    %13 = arith.cmpi ne, %12, %c0_i32_9 : i32
    scf.if %13 {
      %c0_10 = arith.constant 0 : index
      %c0_11 = arith.constant 0 : index
      %14 = vector.load %arg7[%c0_10, %c0_11] : memref<16x128xf32, #tpu.memory_space<vmem>>, vector<16x128xf32>
      %c0_12 = arith.constant 0 : index
      %c0_13 = arith.constant 0 : index
      %15 = vector.load %arg5[%c0_12, %c0_13] : memref<1x128xf32, #tpu.memory_space<vmem>>, vector<1x128xf32>
      %16 = vector.broadcast %15 : vector<1x128xf32> to vector<16x128xf32>
      %17 = arith.addf %14, %16 : vector<16x128xf32>
      %cst_14 = arith.constant 5.000000e-01 : f32
      %18 = vector.broadcast %cst_14 : f32 to vector<16x128xf32>
      %19 = arith.mulf %18, %17 : vector<16x128xf32>
      %cst_15 = arith.constant 0.707106769 : f32
      %20 = vector.broadcast %cst_15 : f32 to vector<16x128xf32>
      %21 = arith.mulf %17, %20 : vector<16x128xf32>
      %22 = math.erf %21 : vector<16x128xf32>
      %cst_16 = arith.constant 1.000000e+00 : f32
      %23 = vector.broadcast %cst_16 : f32 to vector<16x128xf32>
      %24 = arith.addf %23, %22 : vector<16x128xf32>
      %25 = arith.mulf %19, %24 : vector<16x128xf32>
      %c0_17 = arith.constant 0 : index
      %c0_18 = arith.constant 0 : index
      %26 = vector.load %arg6[%c0_17, %c0_18] : memref<16x128xf32, #tpu.memory_space<vmem>>, vector<16x128xf32>
      tpu.vector_store %arg6[%c0_17, %c0_18], %25 {strides = array<i32>} : memref<16x128xf32, #tpu.memory_space<vmem>>, vector<16x128xf32>,
    } else {
    }
    return
  }
  func.func @transform_0(%arg0: i32, %arg1: i32, %arg2: i32) -> (i32, i32) {
    %c0_i32 = arith.constant 0 : i32
    return %arg0, %arg2 : i32, i32
  }
  func.func @transform_1(%arg0: i32, %arg1: i32, %arg2: i32) -> (i32, i32) {
    %c0_i32 = arith.constant 0 : i32
    return %arg2, %arg1 : i32, i32
  }
  func.func @transform_2(%arg0: i32, %arg1: i32, %arg2: i32) -> (i32, i32) {
    %c0_i32 = arith.constant 0 : i32
    %c0_i32_0 = arith.constant 0 : i32
    return %c0_i32, %arg1 : i32, i32
  }
  func.func @transform_3(%arg0: i32, %arg1: i32, %arg2: i32) -> (i32, i32) {
    %c0_i32 = arith.constant 0 : i32
    return %arg0, %arg1 : i32, i32
  }
}

module attributes {stable_mosaic.version = 11 : i64} {
  func.func @_linear_kernel(%arg0: i32, %arg1: i32, %arg2: i32, %arg3: memref<16x64xf32, #tpu.memory_space<vmem>>, %arg4: memref<64x128xf32, #tpu.memory_space<vmem>>, %arg5: memref<1x128xf32, #tpu.memory_space<vmem>>, %arg6: memref<16x128xf32, #tpu.memory_space<vmem>>, %arg7: memref<16x128xf32, #tpu.memory_space<vmem>>) attributes {dimension_semantics = [#tpu.dimension_semantics<parallel>, #tpu.dimension_semantics<parallel>, #tpu.dimension_semantics<arbitrary>], iteration_bounds = array<i64: 1, 1, 1>, scalar_prefetch = 0 : i64, scratch_operands = 1 : i64, tpu.core_type = #tpu.core_type<tc>, window_params = [{transform_indices = @transform_0, window_bounds = array<i64: 16, 64>}, {transform_indices = @transform_1, window_bounds = array<i64: 64, 128>}, {transform_indices = @transform_2, window_bounds = array<i64: 1, 128>}, {transform_indices = @transform_3, window_bounds = array<i64: 16, 128>}]} {
    %c0_i32 = arith.constant 0 : i32
    %0 = arith.cmpi eq, %arg2, %c0_i32 : i32
    %1 = arith.extui %0 : i1 to i32
    %c0_i32_0 = arith.constant 0 : i32
    %2 = arith.cmpi ne, %1, %c0_i32_0 : i32
    scf.if %2 {
      %cst_10 = arith.constant 0.000000e+00 : f32
      %14 = vector.broadcast %cst_10 : f32 to vector<16x128xf32>
      %c0_11 = arith.constant 0 : index
      %c0_12 = arith.constant 0 : index
      %15 = vector.load %arg7[%c0_11, %c0_12] : memref<16x128xf32, #tpu.memory_space<vmem>>, vector<16x128xf32>
      tpu.vector_store %arg7[%c0_11, %c0_12], %14 {strides = array<i32>} : memref<16x128xf32, #tpu.memory_space<vmem>>, vector<16x128xf32>,
    } else {
    }
    %c0 = arith.constant 0 : index
    %c0_1 = arith.constant 0 : index
    %3 = vector.load %arg7[%c0, %c0_1] : memref<16x128xf32, #tpu.memory_space<vmem>>, vector<16x128xf32>
    %c0_2 = arith.constant 0 : index
    %c0_3 = arith.constant 0 : index
    %4 = vector.load %arg3[%c0_2, %c0_3] : memref<16x64xf32, #tpu.memory_space<vmem>>, vector<16x64xf32>
    %5 = arith.truncf %4 : vector<16x64xf32> to vector<16x64xbf16>
    %c0_4 = arith.constant 0 : index
    %c0_5 = arith.constant 0 : index
    %6 = vector.load %arg4[%c0_4, %c0_5] : memref<64x128xf32, #tpu.memory_space<vmem>>, vector<64x128xf32>
    %7 = arith.truncf %6 : vector<64x128xf32> to vector<64x128xbf16>
    %cst = arith.constant dense<0.000000e+00> : vector<16x128xf32>
    %8 = tpu.matmul %5, %7, %cst {dimension_numbers = #tpu.dot_dimension_numbers<[1], [0], [0], [1], [0, 0, 1, 1], [], []>} : vector<16x64xbf16>, vector<64x128xbf16>, vector<16x128xf32> -> vector<16x128xf32>
    %9 = arith.addf %3, %8 : vector<16x128xf32>
    %c0_6 = arith.constant 0 : index
    %c0_7 = arith.constant 0 : index
    %10 = vector.load %arg7[%c0_6, %c0_7] : memref<16x128xf32, #tpu.memory_space<vmem>>, vector<16x128xf32>
    tpu.vector_store %arg7[%c0_6, %c0_7], %9 {strides = array<i32>} : memref<16x128xf32, #tpu.memory_space<vmem>>, vector<16x128xf32>,
    %c0_i32_8 = arith.constant 0 : i32
    %11 = arith.cmpi eq, %arg2, %c0_i32_8 : i32
    %12 = arith.extui %11 : i1 to i32
    %c0_i32_9 = arith.constant 0 : i32
    %13 = arith.cmpi ne, %12, %c0_i32_9 : i32
    scf.if %13 {
      %c0_10 = arith.constant 0 : index
      %c0_11 = arith.constant 0 : index
      %14 = vector.load %arg7[%c0_10, %c0_11] : memref<16x128xf32, #tpu.memory_space<vmem>>, vector<16x128xf32>
      %c0_12 = arith.constant 0 : index
      %c0_13 = arith.constant 0 : index
      %15 = vector.load %arg5[%c0_12, %c0_13] : memref<1x128xf32, #tpu.memory_space<vmem>>, vector<1x128xf32>
      %16 = vector.broadcast %15 : vector<1x128xf32> to vector<16x128xf32>
      %17 = arith.addf %14, %16 : vector<16x128xf32>
      %c0_14 = arith.constant 0 : index
      %c0_15 = arith.constant 0 : index
      %18 = vector.load %arg6[%c0_14, %c0_15] : memref<16x128xf32, #tpu.memory_space<vmem>>, vector<16x128xf32>
      tpu.vector_store %arg6[%c0_14, %c0_15], %17 {strides = array<i32>} : memref<16x128xf32, #tpu.memory_space<vmem>>, vector<16x128xf32>,
    } else {
    }
    return
  }
  func.func @transform_0(%arg0: i32, %arg1: i32, %arg2: i32) -> (i32, i32) {
    %c0_i32 = arith.constant 0 : i32
    return %arg0, %arg2 : i32, i32
  }
  func.func @transform_1(%arg0: i32, %arg1: i32, %arg2: i32) -> (i32, i32) {
    %c0_i32 = arith.constant 0 : i32
    return %arg2, %arg1 : i32, i32
  }
  func.func @transform_2(%arg0: i32, %arg1: i32, %arg2: i32) -> (i32, i32) {
    %c0_i32 = arith.constant 0 : i32
    %c0_i32_0 = arith.constant 0 : i32
    return %c0_i32, %arg1 : i32, i32
  }
  func.func @transform_3(%arg0: i32, %arg1: i32, %arg2: i32) -> (i32, i32) {
    %c0_i32 = arith.constant 0 : i32
    return %arg0, %arg1 : i32, i32
  }
}

module attributes {stable_mosaic.version = 11 : i64} {
  func.func @_linear_res_ln_kernel(%arg0: i32, %arg1: i32, %arg2: i32, %arg3: memref<16x128xf32, #tpu.memory_space<vmem>>, %arg4: memref<128x64xf32, #tpu.memory_space<vmem>>, %arg5: memref<1x64xf32, #tpu.memory_space<vmem>>, %arg6: memref<16x64xf32, #tpu.memory_space<vmem>>, %arg7: memref<1x64xf32, #tpu.memory_space<vmem>>, %arg8: memref<1x64xf32, #tpu.memory_space<vmem>>, %arg9: memref<16x64xf32, #tpu.memory_space<vmem>>, %arg10: memref<16x64xf32, #tpu.memory_space<vmem>>) attributes {dimension_semantics = [#tpu.dimension_semantics<parallel>, #tpu.dimension_semantics<parallel>, #tpu.dimension_semantics<arbitrary>], iteration_bounds = array<i64: 1, 1, 1>, scalar_prefetch = 0 : i64, scratch_operands = 1 : i64, tpu.core_type = #tpu.core_type<tc>, window_params = [{transform_indices = @transform_0, window_bounds = array<i64: 16, 128>}, {transform_indices = @transform_1, window_bounds = array<i64: 128, 64>}, {pipeline_mode = #tpu.pipeline_mode<synchronous>, transform_indices = @transform_2, window_bounds = array<i64: 1, 64>}, {transform_indices = @transform_3, window_bounds = array<i64: 16, 64>}, {pipeline_mode = #tpu.pipeline_mode<synchronous>, transform_indices = @transform_4, window_bounds = array<i64: 1, 64>}, {pipeline_mode = #tpu.pipeline_mode<synchronous>, transform_indices = @transform_5, window_bounds = array<i64: 1, 64>}, {transform_indices = @transform_6, window_bounds = array<i64: 16, 64>}]} {
    %c0_i32 = arith.constant 0 : i32
    %0 = arith.cmpi eq, %arg2, %c0_i32 : i32
    %1 = arith.extui %0 : i1 to i32
    %c0_i32_0 = arith.constant 0 : i32
    %2 = arith.cmpi ne, %1, %c0_i32_0 : i32
    scf.if %2 {
      %cst_10 = arith.constant 0.000000e+00 : f32
      %14 = vector.broadcast %cst_10 : f32 to vector<16x64xf32>
      %c0_11 = arith.constant 0 : index
      %c0_12 = arith.constant 0 : index
      %15 = vector.load %arg10[%c0_11, %c0_12] : memref<16x64xf32, #tpu.memory_space<vmem>>, vector<16x64xf32>
      tpu.vector_store %arg10[%c0_11, %c0_12], %14 {strides = array<i32>} : memref<16x64xf32, #tpu.memory_space<vmem>>, vector<16x64xf32>,
    } else {
    }
    %c0 = arith.constant 0 : index
    %c0_1 = arith.constant 0 : index
    %3 = vector.load %arg10[%c0, %c0_1] : memref<16x64xf32, #tpu.memory_space<vmem>>, vector<16x64xf32>
    %c0_2 = arith.constant 0 : index
    %c0_3 = arith.constant 0 : index
    %4 = vector.load %arg3[%c0_2, %c0_3] : memref<16x128xf32, #tpu.memory_space<vmem>>, vector<16x128xf32>
    %5 = arith.truncf %4 : vector<16x128xf32> to vector<16x128xbf16>
    %c0_4 = arith.constant 0 : index
    %c0_5 = arith.constant 0 : index
    %6 = vector.load %arg4[%c0_4, %c0_5] : memref<128x64xf32, #tpu.memory_space<vmem>>, vector<128x64xf32>
    %7 = arith.truncf %6 : vector<128x64xf32> to vector<128x64xbf16>
    %cst = arith.constant dense<0.000000e+00> : vector<16x64xf32>
    %8 = tpu.matmul %5, %7, %cst {dimension_numbers = #tpu.dot_dimension_numbers<[1], [0], [0], [1], [0, 0, 1, 1], [], []>} : vector<16x128xbf16>, vector<128x64xbf16>, vector<16x64xf32> -> vector<16x64xf32>
    %9 = arith.addf %3, %8 : vector<16x64xf32>
    %c0_6 = arith.constant 0 : index
    %c0_7 = arith.constant 0 : index
    %10 = vector.load %arg10[%c0_6, %c0_7] : memref<16x64xf32, #tpu.memory_space<vmem>>, vector<16x64xf32>
    tpu.vector_store %arg10[%c0_6, %c0_7], %9 {strides = array<i32>} : memref<16x64xf32, #tpu.memory_space<vmem>>, vector<16x64xf32>,
    %c0_i32_8 = arith.constant 0 : i32
    %11 = arith.cmpi eq, %arg2, %c0_i32_8 : i32
    %12 = arith.extui %11 : i1 to i32
    %c0_i32_9 = arith.constant 0 : i32
    %13 = arith.cmpi ne, %12, %c0_i32_9 : i32
    scf.if %13 {
      %c0_10 = arith.constant 0 : index
      %c0_11 = arith.constant 0 : index
      %14 = vector.load %arg10[%c0_10, %c0_11] : memref<16x64xf32, #tpu.memory_space<vmem>>, vector<16x64xf32>
      %c0_12 = arith.constant 0 : index
      %c0_13 = arith.constant 0 : index
      %15 = vector.load %arg5[%c0_12, %c0_13] : memref<1x64xf32, #tpu.memory_space<vmem>>, vector<1x64xf32>
      %16 = vector.broadcast %15 : vector<1x64xf32> to vector<16x64xf32>
      %17 = arith.addf %14, %16 : vector<16x64xf32>
      %c0_14 = arith.constant 0 : index
      %c0_15 = arith.constant 0 : index
      %18 = vector.load %arg6[%c0_14, %c0_15] : memref<16x64xf32, #tpu.memory_space<vmem>>, vector<16x64xf32>
      %19 = arith.addf %17, %18 : vector<16x64xf32>
      %cst_16 = arith.constant dense<0.000000e+00> : vector<16xf32>
      %20 = vector.multi_reduction <add>, %19, %cst_16 [1] : vector<16x64xf32> to vector<16xf32>
      %21 = vector.shape_cast %20 : vector<16xf32> to vector<16x1xf32>
      %cst_17 = arith.constant 6.400000e+01 : f32
      %22 = vector.broadcast %cst_17 : f32 to vector<16x1xf32>
      %23 = arith.divf %21, %22 : vector<16x1xf32>
      %24 = vector.broadcast %23 : vector<16x1xf32> to vector<16x64xf32>
      %25 = arith.subf %19, %24 : vector<16x64xf32>
      %26 = arith.mulf %25, %25 : vector<16x64xf32>
      %cst_18 = arith.constant dense<0.000000e+00> : vector<16xf32>
      %27 = vector.multi_reduction <add>, %26, %cst_18 [1] : vector<16x64xf32> to vector<16xf32>
      %28 = vector.shape_cast %27 : vector<16xf32> to vector<16x1xf32>
      %cst_19 = arith.constant 6.400000e+01 : f32
      %29 = vector.broadcast %cst_19 : f32 to vector<16x1xf32>
      %30 = arith.divf %28, %29 : vector<16x1xf32>
      %31 = vector.broadcast %23 : vector<16x1xf32> to vector<16x64xf32>
      %32 = arith.subf %19, %31 : vector<16x64xf32>
      %cst_20 = arith.constant 9.99999974E-6 : f32
      %33 = vector.broadcast %cst_20 : f32 to vector<16x1xf32>
      %34 = arith.addf %30, %33 : vector<16x1xf32>
      %35 = math.rsqrt %34 : vector<16x1xf32>
      %36 = vector.broadcast %35 : vector<16x1xf32> to vector<16x64xf32>
      %37 = arith.mulf %32, %36 : vector<16x64xf32>
      %c0_21 = arith.constant 0 : index
      %c0_22 = arith.constant 0 : index
      %38 = vector.load %arg7[%c0_21, %c0_22] : memref<1x64xf32, #tpu.memory_space<vmem>>, vector<1x64xf32>
      %39 = vector.broadcast %38 : vector<1x64xf32> to vector<16x64xf32>
      %40 = arith.mulf %37, %39 : vector<16x64xf32>
      %c0_23 = arith.constant 0 : index
      %c0_24 = arith.constant 0 : index
      %41 = vector.load %arg8[%c0_23, %c0_24] : memref<1x64xf32, #tpu.memory_space<vmem>>, vector<1x64xf32>
      %42 = vector.broadcast %41 : vector<1x64xf32> to vector<16x64xf32>
      %43 = arith.addf %40, %42 : vector<16x64xf32>
      %c0_25 = arith.constant 0 : index
      %c0_26 = arith.constant 0 : index
      %44 = vector.load %arg9[%c0_25, %c0_26] : memref<16x64xf32, #tpu.memory_space<vmem>>, vector<16x64xf32>
      tpu.vector_store %arg9[%c0_25, %c0_26], %43 {strides = array<i32>} : memref<16x64xf32, #tpu.memory_space<vmem>>, vector<16x64xf32>,
    } else {
    }
    return
  }
  func.func @transform_0(%arg0: i32, %arg1: i32, %arg2: i32) -> (i32, i32) {
    %c0_i32 = arith.constant 0 : i32
    return %arg0, %arg2 : i32, i32
  }
  func.func @transform_1(%arg0: i32, %arg1: i32, %arg2: i32) -> (i32, i32) {
    %c0_i32 = arith.constant 0 : i32
    %c0_i32_0 = arith.constant 0 : i32
    return %arg2, %c0_i32 : i32, i32
  }
  func.func @transform_2(%arg0: i32, %arg1: i32, %arg2: i32) -> (i32, i32) {
    %c0_i32 = arith.constant 0 : i32
    %c0_i32_0 = arith.constant 0 : i32
    %c0_i32_1 = arith.constant 0 : i32
    return %c0_i32, %c0_i32_0 : i32, i32
  }
  func.func @transform_3(%arg0: i32, %arg1: i32, %arg2: i32) -> (i32, i32) {
    %c0_i32 = arith.constant 0 : i32
    %c0_i32_0 = arith.constant 0 : i32
    return %arg0, %c0_i32 : i32, i32
  }
  func.func @transform_4(%arg0: i32, %arg1: i32, %arg2: i32) -> (i32, i32) {
    %c0_i32 = arith.constant 0 : i32
    %c0_i32_0 = arith.constant 0 : i32
    %c0_i32_1 = arith.constant 0 : i32
    return %c0_i32, %c0_i32_0 : i32, i32
  }
  func.func @transform_5(%arg0: i32, %arg1: i32, %arg2: i32) -> (i32, i32) {
    %c0_i32 = arith.constant 0 : i32
    %c0_i32_0 = arith.constant 0 : i32
    %c0_i32_1 = arith.constant 0 : i32
    return %c0_i32, %c0_i32_0 : i32, i32
  }
  func.func @transform_6(%arg0: i32, %arg1: i32, %arg2: i32) -> (i32, i32) {
    %c0_i32 = arith.constant 0 : i32
    %c0_i32_0 = arith.constant 0 : i32
    return %arg0, %c0_i32 : i32, i32
  }
}

module attributes {stable_mosaic.version = 11 : i64} {
  func.func @_self_attn_kernel(%arg0: i32, %arg1: memref<1x8x192xf32, #tpu.memory_space<vmem>>, %arg2: memref<1x1x8xf32, #tpu.memory_space<vmem>>, %arg3: memref<1x8x64xf32, #tpu.memory_space<vmem>>) attributes {dimension_semantics = [#tpu.dimension_semantics<parallel>], iteration_bounds = array<i64: 2>, scalar_prefetch = 0 : i64, scratch_operands = 0 : i64, tpu.core_type = #tpu.core_type<tc>, window_params = [{transform_indices = @transform_0, window_bounds = array<i64: 1, 8, 192>}, {transform_indices = @transform_1, window_bounds = array<i64: 1, 1, 8>}, {transform_indices = @transform_2, window_bounds = array<i64: 1, 8, 64>}]} {
    %c0 = arith.constant 0 : index
    %c0_0 = arith.constant 0 : index
    %c0_1 = arith.constant 0 : index
    %0 = vector.load %arg1[%c0, %c0_0, %c0_1] : memref<1x8x192xf32, #tpu.memory_space<vmem>>, vector<1x8x192xf32>
    %1 = vector.shape_cast %0 : vector<1x8x192xf32> to vector<8x192xf32>
    %2 = vector.extract_strided_slice %1 {offsets = [0, 0], sizes = [8, 64], strides = [1, 1]} : vector<8x192xf32> to vector<8x64xf32>
    %3 = vector.extract_strided_slice %1 {offsets = [0, 64], sizes = [8, 64], strides = [1, 1]} : vector<8x192xf32> to vector<8x64xf32>
    %4 = vector.extract_strided_slice %1 {offsets = [0, 128], sizes = [8, 64], strides = [1, 1]} : vector<8x192xf32> to vector<8x64xf32>
    %c0_2 = arith.constant 0 : index
    %c0_3 = arith.constant 0 : index
    %c0_4 = arith.constant 0 : index
    %5 = vector.load %arg2[%c0_2, %c0_3, %c0_4] : memref<1x1x8xf32, #tpu.memory_space<vmem>>, vector<1x1x8xf32>
    %6 = vector.shape_cast %5 : vector<1x1x8xf32> to vector<1x8xf32>
    %cst = arith.constant 0.176776692 : f32
    %7 = vector.broadcast %cst : f32 to vector<8x64xf32>
    %8 = arith.mulf %2, %7 : vector<8x64xf32>
    %9 = tpu.iota {dimensions = array<i32: 0>} : vector<8x8xi32>
    %10 = tpu.iota {dimensions = array<i32: 1>} : vector<8x8xi32>
    %11 = arith.cmpi sge, %9, %10 : vector<8x8xi32>
    %cst_5 = arith.constant 0.000000e+00 : f32
    %cst_6 = arith.constant -1.000000e+09 : f32
    %12 = vector.broadcast %cst_5 : f32 to vector<8x8xf32>
    %13 = vector.broadcast %cst_6 : f32 to vector<8x8xf32>
    %14 = arith.select %11, %12, %13 : vector<8x8xi1>, vector<8x8xf32>
    %15 = vector.extract_strided_slice %8 {offsets = [0, 0], sizes = [8, 32], strides = [1, 1]} : vector<8x64xf32> to vector<8x32xf32>
    %16 = arith.truncf %15 : vector<8x32xf32> to vector<8x32xbf16>
    %17 = vector.extract_strided_slice %3 {offsets = [0, 0], sizes = [8, 32], strides = [1, 1]} : vector<8x64xf32> to vector<8x32xf32>
    %18 = arith.truncf %17 : vector<8x32xf32> to vector<8x32xbf16>
    %cst_7 = arith.constant dense<0.000000e+00> : vector<8x8xf32>
    %19 = tpu.matmul %16, %18, %cst_7 {dimension_numbers = #tpu.dot_dimension_numbers<[1], [1], [0], [0], [0, 0, 1, 0], [], []>} : vector<8x32xbf16>, vector<8x32xbf16>, vector<8x8xf32> -> vector<8x8xf32>
    %20 = vector.broadcast %6 : vector<1x8xf32> to vector<8x8xf32>
    %21 = arith.addf %19, %20 : vector<8x8xf32>
    %22 = arith.addf %21, %14 : vector<8x8xf32>
    %cst_8 = arith.constant dense<0xFF800000> : vector<8xf32>
    %23 = vector.multi_reduction <maximumf>, %22, %cst_8 [1] : vector<8x8xf32> to vector<8xf32>
    %24 = vector.shape_cast %23 : vector<8xf32> to vector<8x1xf32>
    %25 = vector.broadcast %24 : vector<8x1xf32> to vector<8x8xf32>
    %26 = arith.subf %22, %25 : vector<8x8xf32>
    %27 = math.exp %26 : vector<8x8xf32>
    %cst_9 = arith.constant dense<0.000000e+00> : vector<8xf32>
    %28 = vector.multi_reduction <add>, %27, %cst_9 [1] : vector<8x8xf32> to vector<8xf32>
    %29 = vector.shape_cast %28 : vector<8xf32> to vector<8x1xf32>
    %30 = arith.truncf %27 : vector<8x8xf32> to vector<8x8xbf16>
    %31 = vector.extract_strided_slice %4 {offsets = [0, 0], sizes = [8, 32], strides = [1, 1]} : vector<8x64xf32> to vector<8x32xf32>
    %32 = arith.truncf %31 : vector<8x32xf32> to vector<8x32xbf16>
    %cst_10 = arith.constant dense<0.000000e+00> : vector<8x32xf32>
    %33 = tpu.matmul %30, %32, %cst_10 {dimension_numbers = #tpu.dot_dimension_numbers<[1], [0], [0], [1], [0, 0, 1, 1], [], []>} : vector<8x8xbf16>, vector<8x32xbf16>, vector<8x32xf32> -> vector<8x32xf32>
    %34 = tpu.reciprocal %29 {approx = true} : vector<8x1xf32> -> vector<8x1xf32>
    %35 = vector.broadcast %34 : vector<8x1xf32> to vector<8x32xf32>
    %36 = arith.mulf %33, %35 : vector<8x32xf32>
    %37 = vector.extract_strided_slice %8 {offsets = [0, 32], sizes = [8, 32], strides = [1, 1]} : vector<8x64xf32> to vector<8x32xf32>
    %38 = arith.truncf %37 : vector<8x32xf32> to vector<8x32xbf16>
    %39 = vector.extract_strided_slice %3 {offsets = [0, 32], sizes = [8, 32], strides = [1, 1]} : vector<8x64xf32> to vector<8x32xf32>
    %40 = arith.truncf %39 : vector<8x32xf32> to vector<8x32xbf16>
    %cst_11 = arith.constant dense<0.000000e+00> : vector<8x8xf32>
    %41 = tpu.matmul %38, %40, %cst_11 {dimension_numbers = #tpu.dot_dimension_numbers<[1], [1], [0], [0], [0, 0, 1, 0], [], []>} : vector<8x32xbf16>, vector<8x32xbf16>, vector<8x8xf32> -> vector<8x8xf32>
    %42 = vector.broadcast %6 : vector<1x8xf32> to vector<8x8xf32>
    %43 = arith.addf %41, %42 : vector<8x8xf32>
    %44 = arith.addf %43, %14 : vector<8x8xf32>
    %cst_12 = arith.constant dense<0xFF800000> : vector<8xf32>
    %45 = vector.multi_reduction <maximumf>, %44, %cst_12 [1] : vector<8x8xf32> to vector<8xf32>
    %46 = vector.shape_cast %45 : vector<8xf32> to vector<8x1xf32>
    %47 = vector.broadcast %46 : vector<8x1xf32> to vector<8x8xf32>
    %48 = arith.subf %44, %47 : vector<8x8xf32>
    %49 = math.exp %48 : vector<8x8xf32>
    %cst_13 = arith.constant dense<0.000000e+00> : vector<8xf32>
    %50 = vector.multi_reduction <add>, %49, %cst_13 [1] : vector<8x8xf32> to vector<8xf32>
    %51 = vector.shape_cast %50 : vector<8xf32> to vector<8x1xf32>
    %52 = arith.truncf %49 : vector<8x8xf32> to vector<8x8xbf16>
    %53 = vector.extract_strided_slice %4 {offsets = [0, 32], sizes = [8, 32], strides = [1, 1]} : vector<8x64xf32> to vector<8x32xf32>
    %54 = arith.truncf %53 : vector<8x32xf32> to vector<8x32xbf16>
    %cst_14 = arith.constant dense<0.000000e+00> : vector<8x32xf32>
    %55 = tpu.matmul %52, %54, %cst_14 {dimension_numbers = #tpu.dot_dimension_numbers<[1], [0], [0], [1], [0, 0, 1, 1], [], []>} : vector<8x8xbf16>, vector<8x32xbf16>, vector<8x32xf32> -> vector<8x32xf32>
    %56 = tpu.reciprocal %51 {approx = true} : vector<8x1xf32> -> vector<8x1xf32>
    %57 = vector.broadcast %56 : vector<8x1xf32> to vector<8x32xf32>
    %58 = arith.mulf %55, %57 : vector<8x32xf32>
    %59 = tpu.concatenate %36, %58 in 1 : vector<8x32xf32>, vector<8x32xf32> -> vector<8x64xf32>
    %c0_15 = arith.constant 0 : index
    %c0_16 = arith.constant 0 : index
    %c0_17 = arith.constant 0 : index
    %60 = vector.load %arg3[%c0_15, %c0_16, %c0_17] : memref<1x8x64xf32, #tpu.memory_space<vmem>>, vector<1x8x64xf32>
    %61 = vector.shape_cast %60 : vector<1x8x64xf32> to vector<8x64xf32>
    %62 = vector.shape_cast %59 : vector<8x64xf32> to vector<1x8x64xf32>
    tpu.vector_store %arg3[%c0_15, %c0_16, %c0_17], %62 {strides = array<i32>} : memref<1x8x64xf32, #tpu.memory_space<vmem>>, vector<1x8x64xf32>,
    return
  }
  func.func @transform_0(%arg0: i32) -> (i32, i32, i32) {
    %c0_i32 = arith.constant 0 : i32
    %c0_i32_0 = arith.constant 0 : i32
    %c0_i32_1 = arith.constant 0 : i32
    return %arg0, %c0_i32, %c0_i32_0 : i32, i32, i32
  }
  func.func @transform_1(%arg0: i32) -> (i32, i32, i32) {
    %c0_i32 = arith.constant 0 : i32
    %c0_i32_0 = arith.constant 0 : i32
    %c0_i32_1 = arith.constant 0 : i32
    return %arg0, %c0_i32, %c0_i32_0 : i32, i32, i32
  }
  func.func @transform_2(%arg0: i32) -> (i32, i32, i32) {
    %c0_i32 = arith.constant 0 : i32
    %c0_i32_0 = arith.constant 0 : i32
    %c0_i32_1 = arith.constant 0 : i32
    return %arg0, %c0_i32, %c0_i32_0 : i32, i32, i32
  }
}

module attributes {stable_mosaic.version = 11 : i64} {
  func.func @_linear_kernel(%arg0: i32, %arg1: i32, %arg2: i32, %arg3: memref<16x64xf32, #tpu.memory_space<vmem>>, %arg4: memref<64x64xf32, #tpu.memory_space<vmem>>, %arg5: memref<1x64xf32, #tpu.memory_space<vmem>>, %arg6: memref<16x64xf32, #tpu.memory_space<vmem>>, %arg7: memref<16x64xf32, #tpu.memory_space<vmem>>) attributes {dimension_semantics = [#tpu.dimension_semantics<parallel>, #tpu.dimension_semantics<parallel>, #tpu.dimension_semantics<arbitrary>], iteration_bounds = array<i64: 1, 1, 1>, scalar_prefetch = 0 : i64, scratch_operands = 1 : i64, tpu.core_type = #tpu.core_type<tc>, window_params = [{transform_indices = @transform_0, window_bounds = array<i64: 16, 64>}, {transform_indices = @transform_1, window_bounds = array<i64: 64, 64>}, {transform_indices = @transform_2, window_bounds = array<i64: 1, 64>}, {transform_indices = @transform_3, window_bounds = array<i64: 16, 64>}]} {
    %c0_i32 = arith.constant 0 : i32
    %0 = arith.cmpi eq, %arg2, %c0_i32 : i32
    %1 = arith.extui %0 : i1 to i32
    %c0_i32_0 = arith.constant 0 : i32
    %2 = arith.cmpi ne, %1, %c0_i32_0 : i32
    scf.if %2 {
      %cst_10 = arith.constant 0.000000e+00 : f32
      %14 = vector.broadcast %cst_10 : f32 to vector<16x64xf32>
      %c0_11 = arith.constant 0 : index
      %c0_12 = arith.constant 0 : index
      %15 = vector.load %arg7[%c0_11, %c0_12] : memref<16x64xf32, #tpu.memory_space<vmem>>, vector<16x64xf32>
      tpu.vector_store %arg7[%c0_11, %c0_12], %14 {strides = array<i32>} : memref<16x64xf32, #tpu.memory_space<vmem>>, vector<16x64xf32>,
    } else {
    }
    %c0 = arith.constant 0 : index
    %c0_1 = arith.constant 0 : index
    %3 = vector.load %arg7[%c0, %c0_1] : memref<16x64xf32, #tpu.memory_space<vmem>>, vector<16x64xf32>
    %c0_2 = arith.constant 0 : index
    %c0_3 = arith.constant 0 : index
    %4 = vector.load %arg3[%c0_2, %c0_3] : memref<16x64xf32, #tpu.memory_space<vmem>>, vector<16x64xf32>
    %5 = arith.truncf %4 : vector<16x64xf32> to vector<16x64xbf16>
    %c0_4 = arith.constant 0 : index
    %c0_5 = arith.constant 0 : index
    %6 = vector.load %arg4[%c0_4, %c0_5] : memref<64x64xf32, #tpu.memory_space<vmem>>, vector<64x64xf32>
    %7 = arith.truncf %6 : vector<64x64xf32> to vector<64x64xbf16>
    %cst = arith.constant dense<0.000000e+00> : vector<16x64xf32>
    %8 = tpu.matmul %5, %7, %cst {dimension_numbers = #tpu.dot_dimension_numbers<[1], [0], [0], [1], [0, 0, 1, 1], [], []>} : vector<16x64xbf16>, vector<64x64xbf16>, vector<16x64xf32> -> vector<16x64xf32>
    %9 = arith.addf %3, %8 : vector<16x64xf32>
    %c0_6 = arith.constant 0 : index
    %c0_7 = arith.constant 0 : index
    %10 = vector.load %arg7[%c0_6, %c0_7] : memref<16x64xf32, #tpu.memory_space<vmem>>, vector<16x64xf32>
    tpu.vector_store %arg7[%c0_6, %c0_7], %9 {strides = array<i32>} : memref<16x64xf32, #tpu.memory_space<vmem>>, vector<16x64xf32>,
    %c0_i32_8 = arith.constant 0 : i32
    %11 = arith.cmpi eq, %arg2, %c0_i32_8 : i32
    %12 = arith.extui %11 : i1 to i32
    %c0_i32_9 = arith.constant 0 : i32
    %13 = arith.cmpi ne, %12, %c0_i32_9 : i32
    scf.if %13 {
      %c0_10 = arith.constant 0 : index
      %c0_11 = arith.constant 0 : index
      %14 = vector.load %arg7[%c0_10, %c0_11] : memref<16x64xf32, #tpu.memory_space<vmem>>, vector<16x64xf32>
      %c0_12 = arith.constant 0 : index
      %c0_13 = arith.constant 0 : index
      %15 = vector.load %arg5[%c0_12, %c0_13] : memref<1x64xf32, #tpu.memory_space<vmem>>, vector<1x64xf32>
      %16 = vector.broadcast %15 : vector<1x64xf32> to vector<16x64xf32>
      %17 = arith.addf %14, %16 : vector<16x64xf32>
      %c0_14 = arith.constant 0 : index
      %c0_15 = arith.constant 0 : index
      %18 = vector.load %arg6[%c0_14, %c0_15] : memref<16x64xf32, #tpu.memory_space<vmem>>, vector<16x64xf32>
      tpu.vector_store %arg6[%c0_14, %c0_15], %17 {strides = array<i32>} : memref<16x64xf32, #tpu.memory_space<vmem>>, vector<16x64xf32>,
    } else {
    }
    return
  }
  func.func @transform_0(%arg0: i32, %arg1: i32, %arg2: i32) -> (i32, i32) {
    %c0_i32 = arith.constant 0 : i32
    return %arg0, %arg2 : i32, i32
  }
  func.func @transform_1(%arg0: i32, %arg1: i32, %arg2: i32) -> (i32, i32) {
    %c0_i32 = arith.constant 0 : i32
    return %arg2, %arg1 : i32, i32
  }
  func.func @transform_2(%arg0: i32, %arg1: i32, %arg2: i32) -> (i32, i32) {
    %c0_i32 = arith.constant 0 : i32
    %c0_i32_0 = arith.constant 0 : i32
    return %c0_i32, %arg1 : i32, i32
  }
  func.func @transform_3(%arg0: i32, %arg1: i32, %arg2: i32) -> (i32, i32) {
    %c0_i32 = arith.constant 0 : i32
    return %arg0, %arg1 : i32, i32
  }
}

module attributes {stable_mosaic.version = 11 : i64} {
  func.func @_cross_attn_kernel(%arg0: i32, %arg1: memref<1x8x64xf32, #tpu.memory_space<vmem>>, %arg2: memref<1x8x128xf32, #tpu.memory_space<vmem>>, %arg3: memref<1x1x8xf32, #tpu.memory_space<vmem>>, %arg4: memref<1x8x64xf32, #tpu.memory_space<vmem>>) attributes {dimension_semantics = [#tpu.dimension_semantics<parallel>], iteration_bounds = array<i64: 2>, scalar_prefetch = 0 : i64, scratch_operands = 0 : i64, tpu.core_type = #tpu.core_type<tc>, window_params = [{transform_indices = @transform_0, window_bounds = array<i64: 1, 8, 64>}, {transform_indices = @transform_1, window_bounds = array<i64: 1, 8, 128>}, {transform_indices = @transform_2, window_bounds = array<i64: 1, 1, 8>}, {transform_indices = @transform_3, window_bounds = array<i64: 1, 8, 64>}]} {
    %c0 = arith.constant 0 : index
    %c0_0 = arith.constant 0 : index
    %c0_1 = arith.constant 0 : index
    %0 = vector.load %arg1[%c0, %c0_0, %c0_1] : memref<1x8x64xf32, #tpu.memory_space<vmem>>, vector<1x8x64xf32>
    %1 = vector.shape_cast %0 : vector<1x8x64xf32> to vector<8x64xf32>
    %c0_2 = arith.constant 0 : index
    %c0_3 = arith.constant 0 : index
    %c0_4 = arith.constant 0 : index
    %2 = vector.load %arg2[%c0_2, %c0_3, %c0_4] : memref<1x8x128xf32, #tpu.memory_space<vmem>>, vector<1x8x128xf32>
    %3 = vector.shape_cast %2 : vector<1x8x128xf32> to vector<8x128xf32>
    %4 = vector.extract_strided_slice %3 {offsets = [0, 0], sizes = [8, 64], strides = [1, 1]} : vector<8x128xf32> to vector<8x64xf32>
    %5 = vector.extract_strided_slice %3 {offsets = [0, 64], sizes = [8, 64], strides = [1, 1]} : vector<8x128xf32> to vector<8x64xf32>
    %c0_5 = arith.constant 0 : index
    %c0_6 = arith.constant 0 : index
    %c0_7 = arith.constant 0 : index
    %6 = vector.load %arg3[%c0_5, %c0_6, %c0_7] : memref<1x1x8xf32, #tpu.memory_space<vmem>>, vector<1x1x8xf32>
    %7 = vector.shape_cast %6 : vector<1x1x8xf32> to vector<1x8xf32>
    %cst = arith.constant 0.176776692 : f32
    %8 = vector.broadcast %cst : f32 to vector<8x64xf32>
    %9 = arith.mulf %1, %8 : vector<8x64xf32>
    %10 = vector.extract_strided_slice %9 {offsets = [0, 0], sizes = [8, 32], strides = [1, 1]} : vector<8x64xf32> to vector<8x32xf32>
    %11 = arith.truncf %10 : vector<8x32xf32> to vector<8x32xbf16>
    %12 = vector.extract_strided_slice %4 {offsets = [0, 0], sizes = [8, 32], strides = [1, 1]} : vector<8x64xf32> to vector<8x32xf32>
    %13 = arith.truncf %12 : vector<8x32xf32> to vector<8x32xbf16>
    %cst_8 = arith.constant dense<0.000000e+00> : vector<8x8xf32>
    %14 = tpu.matmul %11, %13, %cst_8 {dimension_numbers = #tpu.dot_dimension_numbers<[1], [1], [0], [0], [0, 0, 1, 0], [], []>} : vector<8x32xbf16>, vector<8x32xbf16>, vector<8x8xf32> -> vector<8x8xf32>
    %15 = vector.broadcast %7 : vector<1x8xf32> to vector<8x8xf32>
    %16 = arith.addf %14, %15 : vector<8x8xf32>
    %cst_9 = arith.constant dense<0xFF800000> : vector<8xf32>
    %17 = vector.multi_reduction <maximumf>, %16, %cst_9 [1] : vector<8x8xf32> to vector<8xf32>
    %18 = vector.shape_cast %17 : vector<8xf32> to vector<8x1xf32>
    %19 = vector.broadcast %18 : vector<8x1xf32> to vector<8x8xf32>
    %20 = arith.subf %16, %19 : vector<8x8xf32>
    %21 = math.exp %20 : vector<8x8xf32>
    %cst_10 = arith.constant dense<0.000000e+00> : vector<8xf32>
    %22 = vector.multi_reduction <add>, %21, %cst_10 [1] : vector<8x8xf32> to vector<8xf32>
    %23 = vector.shape_cast %22 : vector<8xf32> to vector<8x1xf32>
    %24 = arith.truncf %21 : vector<8x8xf32> to vector<8x8xbf16>
    %25 = vector.extract_strided_slice %5 {offsets = [0, 0], sizes = [8, 32], strides = [1, 1]} : vector<8x64xf32> to vector<8x32xf32>
    %26 = arith.truncf %25 : vector<8x32xf32> to vector<8x32xbf16>
    %cst_11 = arith.constant dense<0.000000e+00> : vector<8x32xf32>
    %27 = tpu.matmul %24, %26, %cst_11 {dimension_numbers = #tpu.dot_dimension_numbers<[1], [0], [0], [1], [0, 0, 1, 1], [], []>} : vector<8x8xbf16>, vector<8x32xbf16>, vector<8x32xf32> -> vector<8x32xf32>
    %28 = tpu.reciprocal %23 {approx = true} : vector<8x1xf32> -> vector<8x1xf32>
    %29 = vector.broadcast %28 : vector<8x1xf32> to vector<8x32xf32>
    %30 = arith.mulf %27, %29 : vector<8x32xf32>
    %31 = vector.extract_strided_slice %9 {offsets = [0, 32], sizes = [8, 32], strides = [1, 1]} : vector<8x64xf32> to vector<8x32xf32>
    %32 = arith.truncf %31 : vector<8x32xf32> to vector<8x32xbf16>
    %33 = vector.extract_strided_slice %4 {offsets = [0, 32], sizes = [8, 32], strides = [1, 1]} : vector<8x64xf32> to vector<8x32xf32>
    %34 = arith.truncf %33 : vector<8x32xf32> to vector<8x32xbf16>
    %cst_12 = arith.constant dense<0.000000e+00> : vector<8x8xf32>
    %35 = tpu.matmul %32, %34, %cst_12 {dimension_numbers = #tpu.dot_dimension_numbers<[1], [1], [0], [0], [0, 0, 1, 0], [], []>} : vector<8x32xbf16>, vector<8x32xbf16>, vector<8x8xf32> -> vector<8x8xf32>
    %36 = vector.broadcast %7 : vector<1x8xf32> to vector<8x8xf32>
    %37 = arith.addf %35, %36 : vector<8x8xf32>
    %cst_13 = arith.constant dense<0xFF800000> : vector<8xf32>
    %38 = vector.multi_reduction <maximumf>, %37, %cst_13 [1] : vector<8x8xf32> to vector<8xf32>
    %39 = vector.shape_cast %38 : vector<8xf32> to vector<8x1xf32>
    %40 = vector.broadcast %39 : vector<8x1xf32> to vector<8x8xf32>
    %41 = arith.subf %37, %40 : vector<8x8xf32>
    %42 = math.exp %41 : vector<8x8xf32>
    %cst_14 = arith.constant dense<0.000000e+00> : vector<8xf32>
    %43 = vector.multi_reduction <add>, %42, %cst_14 [1] : vector<8x8xf32> to vector<8xf32>
    %44 = vector.shape_cast %43 : vector<8xf32> to vector<8x1xf32>
    %45 = arith.truncf %42 : vector<8x8xf32> to vector<8x8xbf16>
    %46 = vector.extract_strided_slice %5 {offsets = [0, 32], sizes = [8, 32], strides = [1, 1]} : vector<8x64xf32> to vector<8x32xf32>
    %47 = arith.truncf %46 : vector<8x32xf32> to vector<8x32xbf16>
    %cst_15 = arith.constant dense<0.000000e+00> : vector<8x32xf32>
    %48 = tpu.matmul %45, %47, %cst_15 {dimension_numbers = #tpu.dot_dimension_numbers<[1], [0], [0], [1], [0, 0, 1, 1], [], []>} : vector<8x8xbf16>, vector<8x32xbf16>, vector<8x32xf32> -> vector<8x32xf32>
    %49 = tpu.reciprocal %44 {approx = true} : vector<8x1xf32> -> vector<8x1xf32>
    %50 = vector.broadcast %49 : vector<8x1xf32> to vector<8x32xf32>
    %51 = arith.mulf %48, %50 : vector<8x32xf32>
    %52 = tpu.concatenate %30, %51 in 1 : vector<8x32xf32>, vector<8x32xf32> -> vector<8x64xf32>
    %c0_16 = arith.constant 0 : index
    %c0_17 = arith.constant 0 : index
    %c0_18 = arith.constant 0 : index
    %53 = vector.load %arg4[%c0_16, %c0_17, %c0_18] : memref<1x8x64xf32, #tpu.memory_space<vmem>>, vector<1x8x64xf32>
    %54 = vector.shape_cast %53 : vector<1x8x64xf32> to vector<8x64xf32>
    %55 = vector.shape_cast %52 : vector<8x64xf32> to vector<1x8x64xf32>
    tpu.vector_store %arg4[%c0_16, %c0_17, %c0_18], %55 {strides = array<i32>} : memref<1x8x64xf32, #tpu.memory_space<vmem>>, vector<1x8x64xf32>,
    return
  }
  func.func @transform_0(%arg0: i32) -> (i32, i32, i32) {
    %c0_i32 = arith.constant 0 : i32
    %c0_i32_0 = arith.constant 0 : i32
    %c0_i32_1 = arith.constant 0 : i32
    return %arg0, %c0_i32, %c0_i32_0 : i32, i32, i32
  }
  func.func @transform_1(%arg0: i32) -> (i32, i32, i32) {
    %c0_i32 = arith.constant 0 : i32
    %c0_i32_0 = arith.constant 0 : i32
    %c0_i32_1 = arith.constant 0 : i32
    return %arg0, %c0_i32, %c0_i32_0 : i32, i32, i32
  }
  func.func @transform_2(%arg0: i32) -> (i32, i32, i32) {
    %c0_i32 = arith.constant 0 : i32
    %c0_i32_0 = arith.constant 0 : i32
    %c0_i32_1 = arith.constant 0 : i32
    return %arg0, %c0_i32, %c0_i32_0 : i32, i32, i32
  }
  func.func @transform_3(%arg0: i32) -> (i32, i32, i32) {
    %c0_i32 = arith.constant 0 : i32
    %c0_i32_0 = arith.constant 0 : i32
    %c0_i32_1 = arith.constant 0 : i32
    return %arg0, %c0_i32, %c0_i32_0 : i32, i32, i32
  }
}

module attributes {stable_mosaic.version = 11 : i64} {
  func.func @_lm_head_kernel(%arg0: i32, %arg1: i32, %arg2: i32, %arg3: memref<16x64xf32, #tpu.memory_space<vmem>>, %arg4: memref<128x64xf32, #tpu.memory_space<vmem>>, %arg5: memref<1x128xf32, #tpu.memory_space<vmem>>, %arg6: memref<16x128xf32, #tpu.memory_space<vmem>>, %arg7: memref<16x128xf32, #tpu.memory_space<vmem>>) attributes {dimension_semantics = [#tpu.dimension_semantics<parallel>, #tpu.dimension_semantics<parallel>, #tpu.dimension_semantics<arbitrary>], iteration_bounds = array<i64: 1, 1, 1>, scalar_prefetch = 0 : i64, scratch_operands = 1 : i64, tpu.core_type = #tpu.core_type<tc>, window_params = [{transform_indices = @transform_0, window_bounds = array<i64: 16, 64>}, {transform_indices = @transform_1, window_bounds = array<i64: 128, 64>}, {transform_indices = @transform_2, window_bounds = array<i64: 1, 128>}, {transform_indices = @transform_3, window_bounds = array<i64: 16, 128>}]} {
    %c0_i32 = arith.constant 0 : i32
    %0 = arith.cmpi eq, %arg2, %c0_i32 : i32
    %1 = arith.extui %0 : i1 to i32
    %c0_i32_0 = arith.constant 0 : i32
    %2 = arith.cmpi ne, %1, %c0_i32_0 : i32
    scf.if %2 {
      %cst_10 = arith.constant 0.000000e+00 : f32
      %14 = vector.broadcast %cst_10 : f32 to vector<16x128xf32>
      %c0_11 = arith.constant 0 : index
      %c0_12 = arith.constant 0 : index
      %15 = vector.load %arg7[%c0_11, %c0_12] : memref<16x128xf32, #tpu.memory_space<vmem>>, vector<16x128xf32>
      tpu.vector_store %arg7[%c0_11, %c0_12], %14 {strides = array<i32>} : memref<16x128xf32, #tpu.memory_space<vmem>>, vector<16x128xf32>,
    } else {
    }
    %c0 = arith.constant 0 : index
    %c0_1 = arith.constant 0 : index
    %3 = vector.load %arg7[%c0, %c0_1] : memref<16x128xf32, #tpu.memory_space<vmem>>, vector<16x128xf32>
    %c0_2 = arith.constant 0 : index
    %c0_3 = arith.constant 0 : index
    %4 = vector.load %arg3[%c0_2, %c0_3] : memref<16x64xf32, #tpu.memory_space<vmem>>, vector<16x64xf32>
    %5 = arith.truncf %4 : vector<16x64xf32> to vector<16x64xbf16>
    %c0_4 = arith.constant 0 : index
    %c0_5 = arith.constant 0 : index
    %6 = vector.load %arg4[%c0_4, %c0_5] : memref<128x64xf32, #tpu.memory_space<vmem>>, vector<128x64xf32>
    %7 = arith.truncf %6 : vector<128x64xf32> to vector<128x64xbf16>
    %cst = arith.constant dense<0.000000e+00> : vector<16x128xf32>
    %8 = tpu.matmul %5, %7, %cst {dimension_numbers = #tpu.dot_dimension_numbers<[1], [1], [0], [0], [0, 0, 1, 0], [], []>} : vector<16x64xbf16>, vector<128x64xbf16>, vector<16x128xf32> -> vector<16x128xf32>
    %9 = arith.addf %3, %8 : vector<16x128xf32>
    %c0_6 = arith.constant 0 : index
    %c0_7 = arith.constant 0 : index
    %10 = vector.load %arg7[%c0_6, %c0_7] : memref<16x128xf32, #tpu.memory_space<vmem>>, vector<16x128xf32>
    tpu.vector_store %arg7[%c0_6, %c0_7], %9 {strides = array<i32>} : memref<16x128xf32, #tpu.memory_space<vmem>>, vector<16x128xf32>,
    %c0_i32_8 = arith.constant 0 : i32
    %11 = arith.cmpi eq, %arg2, %c0_i32_8 : i32
    %12 = arith.extui %11 : i1 to i32
    %c0_i32_9 = arith.constant 0 : i32
    %13 = arith.cmpi ne, %12, %c0_i32_9 : i32
    scf.if %13 {
      %c0_10 = arith.constant 0 : index
      %c0_11 = arith.constant 0 : index
      %14 = vector.load %arg7[%c0_10, %c0_11] : memref<16x128xf32, #tpu.memory_space<vmem>>, vector<16x128xf32>
      %c0_12 = arith.constant 0 : index
      %c0_13 = arith.constant 0 : index
      %15 = vector.load %arg5[%c0_12, %c0_13] : memref<1x128xf32, #tpu.memory_space<vmem>>, vector<1x128xf32>
      %16 = vector.broadcast %15 : vector<1x128xf32> to vector<16x128xf32>
      %17 = arith.addf %14, %16 : vector<16x128xf32>
      %c0_14 = arith.constant 0 : index
      %c0_15 = arith.constant 0 : index
      %18 = vector.load %arg6[%c0_14, %c0_15] : memref<16x128xf32, #tpu.memory_space<vmem>>, vector<16x128xf32>
      tpu.vector_store %arg6[%c0_14, %c0_15], %17 {strides = array<i32>} : memref<16x128xf32, #tpu.memory_space<vmem>>, vector<16x128xf32>,
    } else {
    }
    return
  }
  func.func @transform_0(%arg0: i32, %arg1: i32, %arg2: i32) -> (i32, i32) {
    %c0_i32 = arith.constant 0 : i32
    return %arg0, %arg2 : i32, i32
  }
  func.func @transform_1(%arg0: i32, %arg1: i32, %arg2: i32) -> (i32, i32) {
    %c0_i32 = arith.constant 0 : i32
    return %arg1, %arg2 : i32, i32
  }
  func.func @transform_2(%arg0: i32, %arg1: i32, %arg2: i32) -> (i32, i32) {
    %c0_i32 = arith.constant 0 : i32
    %c0_i32_0 = arith.constant 0 : i32
    return %c0_i32, %arg1 : i32, i32
  }
  func.func @transform_3(%arg0: i32, %arg1: i32, %arg2: i32) -> (i32, i32) {
    %c0_i32 = arith.constant 0 : i32
    return %arg0, %arg1 : i32, i32
  }
}

</mosaic_0001>

<bundles_post_ra>
// kernel: bart_forward.31
= control target key start
LH: loop header
LB: loop body
LE: loop exit
PB: predicated region body
PF: predicated region fallthrough
CT: control target
= control target key end

     0   :  { %vm16_vm0 = vcmask 523264   ;;  %s118_s0 = inlined_call_operand.vmem [shape: f32[16,64], index: 0, kind: input, shape index: {}]   ;;  %s119_s1 = inlined_call_operand.vmem [shape: f32[1,64], index: 1, kind: input, shape index: {}]   ;;  %s120_s2 = inlined_call_operand.vmem [shape: f32[1,64], index: 2, kind: input, shape index: {}]   ;;  %s121_s3 = inlined_call_operand.vmem [shape: f32[16,64], index: 3, kind: output, shape index: {}]  }
   0x1   :  { %v14_v0 = vld [vmem:[%s118_s0] sm:$0xff]  ;;  %v15_v1 = vld [vmem:[%s118_s0 + $0x8] sm:$0xff] }
   0x2   :  { %v17_v2 = vsel %vm16_vm0, %v14_v0, 0.0  ;;  %v20_v3 = vsel %vm16_vm0, %v15_v1, 0.0  ;;  %v68_v21 = vld [vmem:[%s119_s1] ss:$0 sm:$0xff] }
   0x3   :  { %18 = vadd.xlane.f32.xlu0 %v17_v2  ;;  %v69_v23 = vld [vmem:[%s120_s2] ss:$0 sm:$0xff] }
   0x7   :  { %21 = vadd.xlane.f32.xlu0 %v20_v3 }
  0x90   :  { %v19_v4 = vpop.xlane.xlu0 %18 }
  0x91   :  { %v24_v5 = vmul.f32 0.015625, %v19_v4 }
  0x93   :  { %v26_v6 = vsub.f32 %v14_v0, %v24_v5 }
  0x94   :  { %v22_v7 = vpop.xlane.xlu0 %21 }
  0x95   :  { %v25_v8 = vmul.f32 0.015625, %v22_v7  ;;  %v28_v9 = vmul.f32 %v26_v6, %v26_v6 }
  0x97   :  { %v27_v10 = vsub.f32 %v15_v1, %v25_v8  ;;  %v30_v11 = vsel %vm16_vm0, %v28_v9, 0.0 }
  0x98   :  { %31 = vadd.xlane.f32.xlu1 %v30_v11 }
  0x99   :  { %v29_v12 = vmul.f32 %v27_v10, %v27_v10 }
  0x9b   :  { %v33_v13 = vsel %vm16_vm0, %v29_v12, 0.0 }
  0x9c   :  { %34 = vadd.xlane.f32.xlu1 %v33_v13 }
 0x125   :  { %v32_v14 = vpop.xlane.xlu1 %31 }
 0x126   :  { %v36_v15 = vmul.f32 0.015625, %v32_v14 }
 0x128   :  { %v38_v16 = vadd.f32 1e-05, %v36_v15 }
 0x129   :  { %v35_v17 = vpop.xlane.xlu1 %34 }
 0x12a   :  { %70 = vrsqrt.f32 %v38_v16  ;;  %v37_v18 = vmul.f32 0.015625, %v35_v17 }
 0x12c   :  { %v39_v19 = vadd.f32 1e-05, %v37_v18 }
 0x12e   :  { %72 = vrsqrt.f32 %v39_v19 }
 0x134   :  { %v71_v20 = vpop.eup %70 }
 0x135   :  { %v42_v22 = vmul.f32 %v71_v20, %v26_v6 }
 0x137   :  { %v51_v24 = vmul.f32 %v68_v21, %v42_v22 }
 0x138   :  { %v73_v25 = vpop.eup %72 }
 0x139   :  { %v60_v26 = vadd.f32 %v69_v23, %v51_v24  ;;  %v43_v27 = vmul.f32 %v73_v25, %v27_v10 }
 0x13b   :  { %62 = vst.msk [vmem:[%s121_s3] sm:$0xff] %vm16_vm0, %v60_v26  ;;  %v52_v28 = vmul.f32 %v68_v21, %v43_v27 }
 0x13d   :  { %v61_v29 = vadd.f32 %v69_v23, %v52_v28 }
 0x13f   :  { %63 = vst.msk [vmem:[%s121_s3 + $0x8] sm:$0xff] %vm16_vm0, %v61_v29 }

// kernel: bart_forward.32
= control target key start
LH: loop header
LB: loop body
LE: loop exit
PB: predicated region body
PF: predicated region fallthrough
CT: control target
= control target key end

     0   :  { %vm20_vm0 = vcmask 523264   ;;  %v144_v3 = vmov 0   ;;  %v145_v4 = vmov 0.0   ;;  %v119_v29 = vlaneseq  ;;  %s242_s1 = inlined_call_operand.vmem [shape: f32[64,192], index: 1, kind: input, shape index: {}]   ;;  %s243_s0 = inlined_call_operand.vmem [shape: f32[16,64], index: 0, kind: input, shape index: {}]   ;;  %s244_s2 = inlined_call_operand.vmem [shape: f32[1,192], index: 2, kind: input, shape index: {}]   ;;  %s245_s3 = inlined_call_operand.vmem [shape: f32[16,192], index: 3, kind: output, shape index: {}]  }
   0x1   :  { %v32_v0 = vld [vmem:[%s242_s1 + $0x8] sm:$0xff]  ;;  %v34_v1 = vld [vmem:[%s242_s1 + $0x18] sm:$0xff]  ;;  %v31_v2 = vld [vmem:[%s242_s1] sm:$0xff]  ;;  %91 = vmatprep.mubr.bf16.mxu0 %v144_v3  ;;  %21 = vst.msk [vmem:[#allocation2 + $0x8] sm:$0xff] %vm20_vm0, %v145_v4 }
   0x2   :  { %23 = vst.msk [vmem:[#allocation2 + $0x18] sm:$0xff] %vm20_vm0, %v145_v4  ;;  %v48_v5 = vpack.c.bf16 %v34_v1, %v32_v0  ;;  %v33_v6 = vld [vmem:[%s242_s1 + $0x10] sm:$0xff]  ;;  %v36_v7 = vld [vmem:[%s242_s1 + $0x28] sm:$0xff]  ;;  %v38_v8 = vld [vmem:[%s242_s1 + $0x38] sm:$0xff]  ;;  %v120_v30 = vshrl.u32 %v119_v29, 7 }
   0x3   :  { %v47_v9 = vpack.c.bf16 %v33_v6, %v31_v2  ;;  %v50_v10 = vpack.c.bf16 %v38_v8, %v36_v7  ;;  %v35_v11 = vld [vmem:[%s242_s1 + $0x20] sm:$0xff]  ;;  %v37_v12 = vld [vmem:[%s242_s1 + $0x30] sm:$0xff]  ;;  %v40_v13 = vld [vmem:[%s242_s1 + $0x48] sm:$0xff] }
   0x4   :  { %59 = vmatprep.subr.bf16.mxu0 %v48_v5  ;;  %v42_v14 = vld [vmem:[%s242_s1 + $0x58] sm:$0xff]  ;;  %v49_v15 = vpack.c.bf16 %v37_v12, %v35_v11  ;;  %v39_v17 = vld [vmem:[%s242_s1 + $0x40] sm:$0xff]  ;;  %v41_v18 = vld [vmem:[%s242_s1 + $0x50] sm:$0xff]  ;;  %v121_v31 = vsub.s32 0, %v120_v30  ;;  %v125_v42 = vsub.s32 1, %v120_v30 }
   0x5   :  { %60 = vmatpush1.bf16.msra.mxu0 %v47_v9  ;;  %v52_v16 = vpack.c.bf16 %v42_v14, %v40_v13  ;;  %v44_v19 = vld [vmem:[%s242_s1 + $0x68] sm:$0xff]  ;;  %v46_v20 = vld [vmem:[%s242_s1 + $0x78] sm:$0xff]  ;;  %v51_v21 = vpack.c.bf16 %v41_v18, %v39_v17  ;;  %v43_v23 = vld [vmem:[%s242_s1 + $0x60] sm:$0xff] }
   0x6   :  { %61 = vmatprep.subr.bf16.mxu0 %v50_v10  ;;  %v54_v22 = vpack.c.bf16 %v46_v20, %v44_v19  ;;  %v45_v24 = vld [vmem:[%s242_s1 + $0x70] sm:$0xff]  ;;  %v28_v26 = vld [vmem:[%s243_s0] sm:$0xff]  ;;  %v29_v27 = vld [vmem:[%s243_s0 + $0x8] sm:$0xff] }
   0x7   :  { %v53_v25 = vpack.c.bf16 %v45_v24, %v43_v23  ;;  %v30_v28 = vpack.c.bf16 %v29_v27, %v28_v26  ;;  %v117_v32 = vld [vmem:[%s244_s2] sm:$0x3] }
   0x8   :  { %v122_v33 = vrot.slane %v117_v32, %v121_v31  ;;  %v25_v34 = vld [vmem:[#allocation2 + $0x8] sm:$0xff]  ;;  %v126_v45 = vrot.slane %v117_v32, %v125_v42 }
   0x9   :  { %62 = vmatpush1.bf16.msra.mxu0 %v49_v15  ;;  %v27_v37 = vld [vmem:[#allocation2 + $0x18] sm:$0xff] }
   0xa   :  { %63 = vmatprep.subr.bf16.mxu0 %v52_v16 }
   0xd   :  { %64 = vmatpush1.bf16.msra.mxu0 %v51_v21 }
   0xe   :  { %65 = vmatprep.subr.bf16.mxu0 %v54_v22 }
  0x11   :  { %66 = vmatpush1.bf16.msra.mxu0 %v53_v25 }
  0x14   :  { %141 = vmatmul.mubr.msk.bf16.vlgmr.msra.gmra.mrb[0].mxu0 %vm20_vm0, %v30_v28 }
  0xe7   :  { %v93_v35 = vpop.f32.mrb[0].mxu0 }
  0xe8   :  { %v95_v36 = vpop.f32.mrb[1].mxu0  ;;  %v129_v40 = vadd.f32 %v122_v33, %v93_v35 }
  0xe9   :  { %v103_v38 = vadd.f32 %v95_v36, %v25_v34  ;;  %v97_v39 = vpop.f32.mrb[2].mxu0 }
  0xea   :  { %v99_v41 = vpop.f32.mrb[3].mxu0  ;;  %133 = vst [vmem:[%s245_s3] sm:$0xff] %v129_v40  ;;  %v131_v44 = vadd.f32 %v122_v33, %v97_v39 }
  0xeb   :  { %107 = vst.msk [vmem:[#allocation2 + $0x8] sm:$0xff] %vm20_vm0, %v103_v38  ;;  %v105_v43 = vadd.f32 %v99_v41, %v27_v37 }
  0xec   :  { %135 = vst [vmem:[%s245_s3 + $0x10] sm:$0xff] %v131_v44 }
  0xed   :  { %109 = vst.msk [vmem:[#allocation2 + $0x18] sm:$0xff] %vm20_vm0, %v105_v43 }
  0xf2   :  { %v114_v46 = vld [vmem:[#allocation2 + $0x8] sm:$0xff] }
  0xf3   :  { %v130_v47 = vadd.f32 %v126_v45, %v114_v46 }
  0xf4   :  { %v116_v48 = vld [vmem:[#allocation2 + $0x18] sm:$0xff] }
  0xf5   :  { %134 = vst.msk [vmem:[%s245_s3 + $0x8] sm:$0xff] %vm20_vm0, %v130_v47  ;;  %v132_v49 = vadd.f32 %v126_v45, %v116_v48 }
  0xf7   :  { %136 = vst.msk [vmem:[%s245_s3 + $0x18] sm:$0xff] %vm20_vm0, %v132_v49 }

// kernel: bart_forward.34
= control target key start
LH: loop header
LB: loop body
LE: loop exit
PB: predicated region body
PF: predicated region fallthrough
CT: control target
= control target key end

     0   :  { %vm28_vm0 = vcmask 523264   ;;  %v193_v0 = vmov 0.0   ;;  %vm194_vm1 = vmmov 0   ;;  %s292_s1 = inlined_call_operand.vmem [shape: f32[64,64], index: 1, kind: input, shape index: {}]   ;;  %s293_s0 = inlined_call_operand.vmem [shape: f32[16,64], index: 0, kind: input, shape index: {}]   ;;  %s294_s2 = inlined_call_operand.vmem [shape: f32[1,64], index: 2, kind: input, shape index: {}]   ;;  %s295_s3 = inlined_call_operand.vmem [shape: f32[16,64], index: 3, kind: input, shape index: {}]   ;;  %s296_s4 = inlined_call_operand.vmem [shape: f32[1,64], index: 4, kind: input, shape index: {}]   ;;  %s297_s5 = inlined_call_operand.vmem [shape: f32[1,64], index: 5, kind: input, shape index: {}]   ;;  %s298_s6 = inlined_call_operand.vmem [shape: f32[16,64], index: 6, kind: output, shape index: {}]  }
   0x1   :  { %175 = vmatprep.subr.bf16.mxu0 %v193_v0  ;;  %v36_v1 = vld [vmem:[%s292_s1] sm:$0xff]  ;;  %v37_v2 = vld [vmem:[%s292_s1 + $0x8] sm:$0xff]  ;;  %v38_v3 = vld [vmem:[%s292_s1 + $0x10] sm:$0xff]  ;;  %183 = vmatprep.mubr.msk.bf16.mxu0 %vm194_vm1, %v193_v0  ;;  %29 = vst.msk [vmem:[#allocation2] sm:$0xff] %vm28_vm0, %v193_v0 }
   0x2   :  { %30 = vst.msk [vmem:[#allocation2 + $0x8] sm:$0xff] %vm28_vm0, %v193_v0  ;;  %v44_v4 = vpack.c.bf16 %v37_v2, %v36_v1  ;;  %v39_v5 = vld [vmem:[%s292_s1 + $0x18] sm:$0xff]  ;;  %v40_v7 = vld [vmem:[%s292_s1 + $0x20] sm:$0xff]  ;;  %v41_v8 = vld [vmem:[%s292_s1 + $0x28] sm:$0xff] }
   0x3   :  { %v45_v6 = vpack.c.bf16 %v39_v5, %v38_v3  ;;  %v46_v9 = vpack.c.bf16 %v41_v8, %v40_v7  ;;  %v42_v10 = vld [vmem:[%s292_s1 + $0x30] sm:$0xff]  ;;  %v43_v11 = vld [vmem:[%s292_s1 + $0x38] sm:$0xff]  ;;  %v33_v13 = vld [vmem:[%s293_s0] sm:$0xff] }
   0x4   :  { %176 = vmatpush3.bf16.msra.mxu0 %v44_v4  ;;  %v47_v12 = vpack.c.bf16 %v43_v11, %v42_v10  ;;  %v34_v14 = vld [vmem:[%s293_s0 + $0x8] sm:$0xff]  ;;  %v167_v24 = vld [vmem:[%s294_s2] ss:$0 sm:$0xff] }
   0x5   :  { %177 = vmatprep.subr.bf16.mxu0 %v193_v0  ;;  %v35_v15 = vpack.c.bf16 %v34_v14, %v33_v13  ;;  %v111_v26 = vld [vmem:[%s295_s3] sm:$0xff]  ;;  %v112_v29 = vld [vmem:[%s295_s3 + $0x8] sm:$0xff] }
   0x6   :  { %v168_v52 = vld [vmem:[%s296_s4] ss:$0 sm:$0xff] }
   0x7   :  { %v169_v54 = vld [vmem:[%s297_s5] ss:$0 sm:$0xff] }
   0x8   :  { %178 = vmatpush3.bf16.msra.mxu0 %v45_v6  ;;  %v31_v16 = vld [vmem:[#allocation2] sm:$0xff] }
   0x9   :  { %179 = vmatprep.subr.bf16.mxu0 %v193_v0  ;;  %v32_v18 = vld [vmem:[#allocation2 + $0x8] sm:$0xff] }
   0xc   :  { %180 = vmatpush3.bf16.msra.mxu0 %v46_v9 }
   0xd   :  { %181 = vmatprep.subr.bf16.mxu0 %v193_v0 }
  0x10   :  { %182 = vmatpush3.bf16.msra.mxu0 %v47_v12 }
  0x13   :  { %184 = vmatmul.mubr.msk.bf16.vlgmr.msra.gmra.mrb[0].mxu0 %vm28_vm0, %v35_v15 }
  0xe6   :  { %v86_v17 = vpop.f32.mrb[0].mxu0 }
  0xe7   :  { %v93_v19 = vadd.f32 %v86_v17, %v31_v16  ;;  %v185_v20 = vpop.f32.mrb[1].mxu0 }
  0xe8   :  { %v89_v21 = vpop.f32.mrb[2].mxu0 }
  0xe9   :  { %95 = vst.msk [vmem:[#allocation2] sm:$0xff] %vm28_vm0, %v93_v19  ;;  %v94_v22 = vadd.f32 %v89_v21, %v32_v18  ;;  %v186_v23 = vpop.f32.mrb[3].mxu0 }
  0xeb   :  { %96 = vst.msk [vmem:[#allocation2 + $0x8] sm:$0xff] %vm28_vm0, %v94_v22 }
  0xf0   :  { %v100_v25 = vld [vmem:[#allocation2] sm:$0xff] }
  0xf1   :  { %v109_v27 = vadd.f32 %v167_v24, %v100_v25 }
  0xf2   :  { %v101_v28 = vld [vmem:[#allocation2 + $0x8] sm:$0xff] }
  0xf3   :  { %v113_v30 = vadd.f32 %v111_v26, %v109_v27  ;;  %v110_v31 = vadd.f32 %v167_v24, %v101_v28 }
  0xf5   :  { %v115_v32 = vsel %vm28_vm0, %v113_v30, 0.0  ;;  %v114_v33 = vadd.f32 %v112_v29, %v110_v31 }
  0xf6   :  { %116 = vadd.xlane.f32.xlu0 %v115_v32 }
  0xf7   :  { %v118_v34 = vsel %vm28_vm0, %v114_v33, 0.0 }
  0xfa   :  { %119 = vadd.xlane.f32.xlu0 %v118_v34 }
 0x183   :  { %v117_v35 = vpop.xlane.xlu0 %116 }
 0x184   :  { %v122_v36 = vmul.f32 0.015625, %v117_v35 }
 0x186   :  { %v124_v37 = vsub.f32 %v113_v30, %v122_v36 }
 0x187   :  { %v120_v38 = vpop.xlane.xlu0 %119 }
 0x188   :  { %v123_v39 = vmul.f32 0.015625, %v120_v38  ;;  %v126_v40 = vmul.f32 %v124_v37, %v124_v37 }
 0x18a   :  { %v125_v41 = vsub.f32 %v114_v33, %v123_v39  ;;  %v128_v42 = vsel %vm28_vm0, %v126_v40, 0.0 }
 0x18b   :  { %129 = vadd.xlane.f32.xlu1 %v128_v42 }
 0x18c   :  { %v127_v43 = vmul.f32 %v125_v41, %v125_v41 }
 0x18e   :  { %v131_v44 = vsel %vm28_vm0, %v127_v43, 0.0 }
 0x18f   :  { %132 = vadd.xlane.f32.xlu1 %v131_v44 }
 0x218   :  { %v130_v45 = vpop.xlane.xlu1 %129 }
 0x219   :  { %v134_v46 = vmul.f32 0.015625, %v130_v45 }
 0x21b   :  { %v136_v47 = vadd.f32 1e-05, %v134_v46 }
 0x21c   :  { %v133_v48 = vpop.xlane.xlu1 %132 }
 0x21d   :  { %189 = vrsqrt.f32 %v136_v47  ;;  %v135_v49 = vmul.f32 0.015625, %v133_v48 }
 0x21f   :  { %v137_v50 = vadd.f32 1e-05, %v135_v49 }
 0x221   :  { %191 = vrsqrt.f32 %v137_v50 }
 0x227   :  { %v190_v51 = vpop.eup %189 }
 0x228   :  { %v140_v53 = vmul.f32 %v190_v51, %v124_v37 }
 0x22a   :  { %v149_v55 = vmul.f32 %v168_v52, %v140_v53 }
 0x22b   :  { %v192_v56 = vpop.eup %191 }
 0x22c   :  { %v158_v57 = vadd.f32 %v169_v54, %v149_v55  ;;  %v141_v58 = vmul.f32 %v192_v56, %v125_v41 }
 0x22e   :  { %160 = vst.msk [vmem:[%s298_s6] sm:$0xff] %vm28_vm0, %v158_v57  ;;  %v150_v59 = vmul.f32 %v168_v52, %v141_v58 }
 0x230   :  { %v159_v60 = vadd.f32 %v169_v54, %v150_v59 }
 0x232   :  { %161 = vst.msk [vmem:[%s298_s6 + $0x8] sm:$0xff] %vm28_vm0, %v159_v60 }

// kernel: bart_forward.33
= control target key start
LH: loop header
LB: loop body
LE: loop exit
PB: predicated region body
PF: predicated region fallthrough
CT: control target
= control target key end

     0   :  { %s558_s9 = smov 0   ;;  %s602_s0 = inlined_call_operand.vmem [shape: f32[2,8,192], index: 0, kind: input, shape index: {}]   ;;  %s603_s1 = inlined_call_operand.vmem [shape: f32[2,1,8], index: 1, kind: input, shape index: {}]   ;;  %s604_s2 = inlined_call_operand.vmem [shape: f32[2,8,64], index: 2, kind: output, shape index: {}]  }
   0x1 LB: > { %s461_s10 = sadd.s32 4294967295, %s536_s9   ;;  %p465_p0 = scmp.ge.s32.totalorder %s536_s9, 1  ;;  %s536_s9 = sphi %s558_s9, %s12_s9  }
   0x2   : > { %p120_p1 = scmp.lt.s32.totalorder %s536_s9, 3 }
   0x4   : > { %p121_p2 = pnand %p465_p0, %p120_p1 }
   0x5   : > { %p144_p3 = scmp.lt.s32.totalorder (!%p121_p2), %s461_s10, 1  ;;  %v538_v0 = vmov (!%p121_p2), 0.0   ;;  %vm539_vm0 = vmmov (!%p121_p2), 0   ;;  %s540_s15 = smov (!%p121_p2), 64   ;;  %vm172_vm1 = vcmask (!%p121_p2), 261120   ;;  %vm219_vm2 = vcmask (!%p121_p2), 64512  }
   0x6   : > { %124 = sbr.rel (%p121_p2) target bundleno = 1229 (0x4cd), region = 28  ;;  %485 = vmatprep.subr.bf16.mxu0 (!%p121_p2), %v538_v0  ;;  %487 = vmatprep.mubr.msk.bf16.mxu0 (!%p121_p2), %vm539_vm0, %v538_v0  ;;  %s541_s16 = smov (!%p121_p2), 32   ;;  %vm234_vm3 = vcmask (!%p121_p2), 1043456   ;;  %vm397_vm4 = vcmask (!%p121_p2), 523264  }
   0x7   : > { %491 = vmatprep.subr.bf16.mxu1 (!%p121_p2), %v538_v0  ;;  %493 = vmatprep.mubr.msk.bf16.mxu1 (!%p121_p2), %vm539_vm0, %v538_v0  ;;  %s542_s17 = smov (!%p121_p2), 96  }
   0xd   : > { %s606_s10 = smov (!%p144_p3, %s461_s10), 1 }
   0xe   : > { %s476_s11 = sshll.u32 %s606_s10, 4  ;;  %s151_s20 = scalar_lea.vmem %s603_s1, %s606_s10 }
   0xf   : > { %s148_s14 = scalar_lea.vmem %s602_s0, %s476_s11  ;;  %v469_v7 = vld [vmem:[%s151_s20] ss:$0 sm:$0xff]  ;;  %s468_s21 = sshll.u32 %s606_s10, 3 }
  0x10   : > { %v157_v1 = vld [vmem:[%s148_s14] sm:$0xff]  ;;  %v158_v14 = vld [vmem:[%s148_s14 + $0x8] sm:$0xff]  ;;  %s155_s24 = scalar_lea.vmem %s604_s2, %s468_s21 }
  0x11   : > { %v162_v2 = vpack.c.bf16 %v157_v1, %v157_v1  ;;  %v160_v4 = vmul.f32 0.17677669, %v157_v1  ;;  %v230_v15 = vpack.c.bf16 %v158_v14, %v158_v14 }
  0x13   : > { %170 = vrot.lane.b32.xlu0 %v162_v2, %s540_s15  ;;  %v161_v6 = vpack.c.bf16 %v160_v4, %v160_v4  ;;  %283 = vrot.lane.b32.xlu1 %v162_v2, %s541_s16  ;;  %v236_v16 = vsel %vm234_vm3, %v230_v15, 0 }
  0x14   : > { %492 = vmatpush3.bf16.msra.mxu1 %v236_v16 }
  0x15   : > { %497 = vmatprep.subr.bf16.mxu1 %v538_v0 }
  0x17   : > { %281 = vrot.lane.b32.xlu1 %v161_v6, %s542_s17 }
  0x85   : > { %v171_v3 = vpop.permute.xlu0 %170  ;;  %v284_v20 = vpop.permute.xlu1 %283 }
  0x86   : > { %v177_v5 = vsel %vm172_vm1, %v171_v3, 0  ;;  %v289_v22 = vsel %vm172_vm1, %v284_v20, 0 }
  0x87   : > { %486 = vmatpush3.bf16.xpose.msra.mxu0 %v177_v5 }
  0x88   : > { %503 = vmatprep.subr.bf16.mxu0 %v538_v0 }
  0x89   : > { %v282_v24 = vpop.permute.xlu1 %281 }
  0x8e   : > { %488 = vmatmul.mubr.msk.bf16.vlgmr.msra.gmra.mrb[0].mxu0 %vm172_vm1, %v161_v6 }
  0x8f   : > { %505 = vmatprep.mubr.msk.bf16.mxu0 %vm539_vm0, %v538_v0 }
 0x161   : > { %v213_v8 = vpop.f32.mrb[0].mxu0 }
 0x162   : > { %v214_v9 = vadd.f32 %v469_v7, %v213_v8  ;;  %v489_v10 = vpop.f32.mrb[1].mxu0 }
 0x163   : > { %v216_v11 = vpop.f32.mrb[2].mxu0 }
 0x164   : > { %v490_v12 = vpop.f32.mrb[3].mxu0  ;;  %v220_v13 = vsel %vm219_vm2, %v214_v9, -inf }
 0x165   : > { %221 = vmax.xlane.f32.xlu0 %v220_v13 }
 0x17b   : > { %342 = vrot.lane.b32.xlu0 %v230_v15, %s542_s17 }
 0x1f2   : > { %v222_v17 = vpop.xlane.xlu0 %221 }
 0x1f3   : > { %v223_v18 = vsub.f32 %v214_v9, %v222_v17 }
 0x1f5   : > { %v224_v19 = vmul.f32 1.442695, %v223_v18 }
 0x1f6   : > { %v343_v35 = vpop.permute.xlu0 %342 }
 0x1f7   : > { %522 = vpow2.f32 %v224_v19  ;;  %v348_v36 = vsel %vm234_vm3, %v343_v35, 0 }
 0x1f8   : > { %504 = vmatpush3.bf16.msra.mxu0 %v348_v36 }
 0x201   : > { %v523_v21 = vpop.eup %522 }
 0x202   : > { %v229_v23 = vpack.c.bf16 %v523_v21, %v523_v21  ;;  %v226_v43 = vsel %vm219_vm2, %v523_v21, 0.0 }
 0x204   : > { %494 = vmatmul.mubr.msk.bf16.vlgmr.msra.gmra.mrb[0].mxu1 %vm219_vm2, %v229_v23 }
 0x205   : > { %498 = vmatpush3.bf16.xpose.msra.mxu1 %v289_v22  ;;  %499 = vmatprep.mubr.msk.bf16.mxu1 %vm539_vm0, %v538_v0 }
 0x20c   : > { %500 = vmatmul.mubr.msk.bf16.vlgmr.msra.gmra.mrb[4].mxu1 %vm172_vm1, %v282_v24 }
 0x2d7   : > { %v272_v25 = vpop.f32.mrb[0].mxu1 }
 0x2d8   : > { %v495_v26 = vpop.f32.mrb[1].mxu1 }
 0x2d9   : > { %v275_v27 = vpop.f32.mrb[2].mxu1 }
 0x2da   : > { %v496_v28 = vpop.f32.mrb[3].mxu1 }
 0x2df   : > { %v325_v29 = vpop.f32.mrb[4].mxu1 }
 0x2e0   : > { %v326_v30 = vadd.f32 %v469_v7, %v325_v29  ;;  %v501_v31 = vpop.f32.mrb[5].mxu1 }
 0x2e1   : > { %v328_v32 = vpop.f32.mrb[6].mxu1 }
 0x2e2   : > { %v502_v33 = vpop.f32.mrb[7].mxu1  ;;  %v331_v34 = vsel %vm219_vm2, %v326_v30, -inf }
 0x2e3   : > { %332 = vmax.xlane.f32.xlu1 %v331_v34 }
 0x370   : > { %v333_v37 = vpop.xlane.xlu1 %332 }
 0x371   : > { %v334_v38 = vsub.f32 %v326_v30, %v333_v37 }
 0x373   : > { %v335_v39 = vmul.f32 1.442695, %v334_v38 }
 0x375   : > { %524 = vpow2.f32 %v335_v39 }
 0x37f   : > { %v525_v40 = vpop.eup %524 }
 0x380   : > { %v337_v41 = vsel %vm219_vm2, %v525_v40, 0.0  ;;  %v340_v42 = vpack.c.bf16 %v525_v40, %v525_v40 }
 0x381   : > { %338 = vadd.xlane.f32.xlu1 %v337_v41 }
 0x382   : > { %506 = vmatmul.mubr.msk.bf16.vlgmr.msra.gmra.mrb[4].mxu0 %vm219_vm2, %v340_v42 }
 0x385   : > { %227 = vadd.xlane.f32.xlu1 %v226_v43 }
 0x40e   : > { %v339_v44 = vpop.xlane.xlu1 %338 }
 0x40f   : > { %526 = vrcp.f32 %v339_v44 }
 0x412   : > { %v228_v51 = vpop.xlane.xlu1 %227 }
 0x413   : > { %528 = vrcp.f32 %v228_v51 }
 0x419   : > { %v527_v45 = vpop.eup %526 }
 0x41d   : > { %v529_v52 = vpop.eup %528 }
 0x41e   : > { %v279_v53 = vmul.f32 %v529_v52, %v272_v25 }
 0x455   : > { %v384_v46 = vpop.f32.mrb[4].mxu0 }
 0x456   : > { %v391_v47 = vmul.f32 %v527_v45, %v384_v46  ;;  %v507_v48 = vpop.f32.mrb[5].mxu0 }
 0x457   : > { %v387_v49 = vpop.f32.mrb[6].mxu0 }
 0x458   : > { %393 = vrot.lane.b32.xlu1 %v391_v47, %s541_s16  ;;  %v508_v50 = vpop.f32.mrb[7].mxu0 }
 0x4ca   : > { %v394_v54 = vpop.permute.xlu1 %393 }
 0x4cb   : > { %v396_v55 = vsel %vm172_vm1, %v279_v53, %v394_v54 }
 0x4cc   : > { %398 = vst.msk [vmem:[%s155_s24] sm:$0xff] %vm397_vm4, %v396_v55 }
 0x4cd PF: > { %s12_s9 = sadd.s32 1, %s536_s9  }
 0x4ce   : > { %p9_p4 = scmp.ge.s32.totalorder %s12_s9, 4  }
 0x4d0   :  { %11 = sbr.rel (!%p9_p4) target bundleno = 1 (0x1), region = 61 }

// kernel: bart_forward.35
= control target key start
LH: loop header
LB: loop body
LE: loop exit
PB: predicated region body
PF: predicated region fallthrough
CT: control target
= control target key end

     0   :  { %v142_v0 = vmov 0.0   ;;  %vm143_vm0 = vmmov 0   ;;  %vm38_vm1 = vcmask 523264   ;;  %s203_s1 = inlined_call_operand.vmem [shape: f32[64,128], index: 1, kind: input, shape index: {}]   ;;  %s204_s0 = inlined_call_operand.vmem [shape: f32[16,64], index: 0, kind: input, shape index: {}]   ;;  %s205_s2 = inlined_call_operand.vmem [shape: f32[1,128], index: 2, kind: input, shape index: {}]   ;;  %s206_s3 = inlined_call_operand.vmem [shape: f32[16,128], index: 3, kind: output, shape index: {}]  }
   0x1   :  { %124 = vmatprep.subr.bf16.mxu0 %v142_v0  ;;  %v26_v1 = vld [vmem:[%s203_s1] sm:$0xff]  ;;  %v27_v2 = vld [vmem:[%s203_s1 + $0x8] sm:$0xff]  ;;  %v28_v3 = vld [vmem:[%s203_s1 + $0x10] sm:$0xff]  ;;  %132 = vmatprep.mubr.msk.bf16.mxu0 %vm143_vm0, %v142_v0 }
   0x2   :  { %v34_v4 = vpack.c.bf16 %v27_v2, %v26_v1  ;;  %v29_v5 = vld [vmem:[%s203_s1 + $0x18] sm:$0xff]  ;;  %v30_v7 = vld [vmem:[%s203_s1 + $0x20] sm:$0xff]  ;;  %v31_v8 = vld [vmem:[%s203_s1 + $0x28] sm:$0xff] }
   0x3   :  { %v35_v6 = vpack.c.bf16 %v29_v5, %v28_v3  ;;  %v36_v9 = vpack.c.bf16 %v31_v8, %v30_v7  ;;  %v32_v10 = vld [vmem:[%s203_s1 + $0x30] sm:$0xff]  ;;  %v33_v11 = vld [vmem:[%s203_s1 + $0x38] sm:$0xff]  ;;  %v23_v13 = vld [vmem:[%s204_s0] sm:$0xff] }
   0x4   :  { %125 = vmatpush3.bf16.msra.mxu0 %v34_v4  ;;  %v37_v12 = vpack.c.bf16 %v33_v11, %v32_v10  ;;  %v24_v14 = vld [vmem:[%s204_s0 + $0x8] sm:$0xff]  ;;  %v118_v16 = vld [vmem:[%s205_s2] ss:$0 sm:$0xff] }
   0x5   :  { %126 = vmatprep.subr.bf16.mxu0 %v142_v0  ;;  %v25_v15 = vpack.c.bf16 %v24_v14, %v23_v13 }
   0x8   :  { %127 = vmatpush3.bf16.msra.mxu0 %v35_v6 }
   0x9   :  { %128 = vmatprep.subr.bf16.mxu0 %v142_v0 }
   0xc   :  { %129 = vmatpush3.bf16.msra.mxu0 %v36_v9 }
   0xd   :  { %130 = vmatprep.subr.bf16.mxu0 %v142_v0 }
  0x10   :  { %131 = vmatpush3.bf16.msra.mxu0 %v37_v12 }
  0x13   :  { %133 = vmatmul.mubr.msk.bf16.vlgmr.msra.gmra.mrb[0].mxu0 %vm38_vm1, %v25_v15 }
  0xe6   :  { %v76_v17 = vpop.f32.mrb[0].mxu0 }
  0xe7   :  { %v99_v18 = vadd.f32 %v118_v16, %v76_v17  ;;  %v134_v19 = vpop.f32.mrb[1].mxu0 }
  0xe8   :  { %v79_v20 = vpop.f32.mrb[2].mxu0 }
  0xe9   :  { %v103_v21 = vmul.f32 0.70710677, %v99_v18  ;;  %v100_v22 = vadd.f32 %v118_v16, %v79_v20  ;;  %v135_v23 = vpop.f32.mrb[3].mxu0  ;;  %v101_v26 = vmul.f32 0.5, %v99_v18 }
  0xeb   :  { %138 = verf.f32 %v103_v21  ;;  %v104_v24 = vmul.f32 0.70710677, %v100_v22  ;;  %v102_v30 = vmul.f32 0.5, %v100_v22 }
  0xed   :  { %140 = verf.f32 %v104_v24 }
  0xf5   :  { %v139_v25 = vpop.eup %138 }
  0xf6   :  { %v107_v27 = vadd.f32 1.0, %v139_v25 }
  0xf7   :  { %v141_v28 = vpop.eup %140 }
  0xf8   :  { %v109_v29 = vmul.f32 %v107_v27, %v101_v26  ;;  %v108_v31 = vadd.f32 1.0, %v141_v28 }
  0xfa   :  { %111 = vst [vmem:[%s206_s3] sm:$0xff] %v109_v29  ;;  %v110_v32 = vmul.f32 %v108_v31, %v102_v30 }
  0xfc   :  { %112 = vst [vmem:[%s206_s3 + $0x8] sm:$0xff] %v110_v32 }

// kernel: bart_forward.47
= control target key start
LH: loop header
LB: loop body
LE: loop exit
PB: predicated region body
PF: predicated region fallthrough
CT: control target
= control target key end

     0   :  { %v128_v0 = vmov 0.0   ;;  %vm129_vm0 = vmmov 0   ;;  %vm38_vm1 = vcmask 523264   ;;  %s189_s1 = inlined_call_operand.vmem [shape: f32[64,128], index: 1, kind: input, shape index: {}]   ;;  %s190_s0 = inlined_call_operand.vmem [shape: f32[16,64], index: 0, kind: input, shape index: {}]   ;;  %s191_s2 = inlined_call_operand.vmem [shape: f32[1,128], index: 2, kind: input, shape index: {}]   ;;  %s192_s3 = inlined_call_operand.vmem [shape: f32[16,128], index: 3, kind: output, shape index: {}]  }
   0x1   :  { %114 = vmatprep.subr.bf16.mxu0 %v128_v0  ;;  %v26_v1 = vld [vmem:[%s189_s1] sm:$0xff]  ;;  %v27_v2 = vld [vmem:[%s189_s1 + $0x8] sm:$0xff]  ;;  %v28_v3 = vld [vmem:[%s189_s1 + $0x10] sm:$0xff]  ;;  %122 = vmatprep.mubr.msk.bf16.mxu0 %vm129_vm0, %v128_v0 }
   0x2   :  { %v34_v4 = vpack.c.bf16 %v27_v2, %v26_v1  ;;  %v29_v5 = vld [vmem:[%s189_s1 + $0x18] sm:$0xff]  ;;  %v30_v7 = vld [vmem:[%s189_s1 + $0x20] sm:$0xff]  ;;  %v31_v8 = vld [vmem:[%s189_s1 + $0x28] sm:$0xff] }
   0x3   :  { %v35_v6 = vpack.c.bf16 %v29_v5, %v28_v3  ;;  %v36_v9 = vpack.c.bf16 %v31_v8, %v30_v7  ;;  %v32_v10 = vld [vmem:[%s189_s1 + $0x30] sm:$0xff]  ;;  %v33_v11 = vld [vmem:[%s189_s1 + $0x38] sm:$0xff]  ;;  %v23_v13 = vld [vmem:[%s190_s0] sm:$0xff] }
   0x4   :  { %115 = vmatpush3.bf16.msra.mxu0 %v34_v4  ;;  %v37_v12 = vpack.c.bf16 %v33_v11, %v32_v10  ;;  %v24_v14 = vld [vmem:[%s190_s0 + $0x8] sm:$0xff]  ;;  %v108_v16 = vld [vmem:[%s191_s2] ss:$0 sm:$0xff] }
   0x5   :  { %116 = vmatprep.subr.bf16.mxu0 %v128_v0  ;;  %v25_v15 = vpack.c.bf16 %v24_v14, %v23_v13 }
   0x8   :  { %117 = vmatpush3.bf16.msra.mxu0 %v35_v6 }
   0x9   :  { %118 = vmatprep.subr.bf16.mxu0 %v128_v0 }
   0xc   :  { %119 = vmatpush3.bf16.msra.mxu0 %v36_v9 }
   0xd   :  { %120 = vmatprep.subr.bf16.mxu0 %v128_v0 }
  0x10   :  { %121 = vmatpush3.bf16.msra.mxu0 %v37_v12 }
  0x13   :  { %123 = vmatmul.mubr.msk.bf16.vlgmr.msra.gmra.mrb[0].mxu0 %vm38_vm1, %v25_v15 }
  0xe6   :  { %v76_v17 = vpop.f32.mrb[0].mxu0 }
  0xe7   :  { %v99_v18 = vadd.f32 %v108_v16, %v76_v17  ;;  %v124_v19 = vpop.f32.mrb[1].mxu0 }
  0xe8   :  { %v79_v20 = vpop.f32.mrb[2].mxu0 }
  0xe9   :  { %101 = vst [vmem:[%s192_s3] sm:$0xff] %v99_v18  ;;  %v100_v21 = vadd.f32 %v108_v16, %v79_v20  ;;  %v125_v22 = vpop.f32.mrb[3].mxu0 }
  0xeb   :  { %102 = vst [vmem:[%s192_s3 + $0x8] sm:$0xff] %v100_v21 }

// kernel: bart_forward.36
= control target key start
LH: loop header
LB: loop body
LE: loop exit
PB: predicated region body
PF: predicated region fallthrough
CT: control target
= control target key end

     0   :  { %vm28_vm0 = vcmask 523264   ;;  %v213_v0 = vmov 0.0   ;;  %vm214_vm1 = vmmov 0   ;;  %s335_s1 = inlined_call_operand.vmem [shape: f32[128,64], index: 1, kind: input, shape index: {}]   ;;  %s336_s0 = inlined_call_operand.vmem [shape: f32[16,128], index: 0, kind: input, shape index: {}]   ;;  %s337_s2 = inlined_call_operand.vmem [shape: f32[1,64], index: 2, kind: input, shape index: {}]   ;;  %s338_s3 = inlined_call_operand.vmem [shape: f32[16,64], index: 3, kind: input, shape index: {}]   ;;  %s339_s4 = inlined_call_operand.vmem [shape: f32[1,64], index: 4, kind: input, shape index: {}]   ;;  %s340_s5 = inlined_call_operand.vmem [shape: f32[1,64], index: 5, kind: input, shape index: {}]   ;;  %s341_s6 = inlined_call_operand.vmem [shape: f32[16,64], index: 6, kind: output, shape index: {}]  }
   0x1   :  { %187 = vmatprep.subr.bf16.mxu0 %v213_v0  ;;  %v36_v1 = vld [vmem:[%s335_s1] sm:$0xff]  ;;  %v37_v2 = vld [vmem:[%s335_s1 + $0x8] sm:$0xff]  ;;  %v38_v3 = vld [vmem:[%s335_s1 + $0x10] sm:$0xff]  ;;  %203 = vmatprep.mubr.msk.bf16.mxu0 %vm214_vm1, %v213_v0  ;;  %29 = vst.msk [vmem:[#allocation2] sm:$0xff] %vm28_vm0, %v213_v0 }
   0x2   :  { %30 = vst.msk [vmem:[#allocation2 + $0x8] sm:$0xff] %vm28_vm0, %v213_v0  ;;  %v52_v4 = vpack.c.bf16 %v37_v2, %v36_v1  ;;  %v39_v5 = vld [vmem:[%s335_s1 + $0x18] sm:$0xff]  ;;  %v40_v7 = vld [vmem:[%s335_s1 + $0x20] sm:$0xff]  ;;  %v41_v8 = vld [vmem:[%s335_s1 + $0x28] sm:$0xff] }
   0x3   :  { %v53_v6 = vpack.c.bf16 %v39_v5, %v38_v3  ;;  %v54_v9 = vpack.c.bf16 %v41_v8, %v40_v7  ;;  %v42_v10 = vld [vmem:[%s335_s1 + $0x30] sm:$0xff]  ;;  %v43_v11 = vld [vmem:[%s335_s1 + $0x38] sm:$0xff]  ;;  %v44_v13 = vld [vmem:[%s335_s1 + $0x40] sm:$0xff] }
   0x4   :  { %188 = vmatpush3.bf16.msra.mxu0 %v52_v4  ;;  %v55_v12 = vpack.c.bf16 %v43_v11, %v42_v10  ;;  %v45_v14 = vld [vmem:[%s335_s1 + $0x48] sm:$0xff]  ;;  %v46_v16 = vld [vmem:[%s335_s1 + $0x50] sm:$0xff]  ;;  %v47_v17 = vld [vmem:[%s335_s1 + $0x58] sm:$0xff] }
   0x5   :  { %189 = vmatprep.subr.bf16.mxu0 %v213_v0  ;;  %v56_v15 = vpack.c.bf16 %v45_v14, %v44_v13  ;;  %v57_v18 = vpack.c.bf16 %v47_v17, %v46_v16  ;;  %v48_v19 = vld [vmem:[%s335_s1 + $0x60] sm:$0xff]  ;;  %v49_v20 = vld [vmem:[%s335_s1 + $0x68] sm:$0xff]  ;;  %v50_v22 = vld [vmem:[%s335_s1 + $0x70] sm:$0xff] }
   0x6   :  { %v58_v21 = vpack.c.bf16 %v49_v20, %v48_v19  ;;  %v51_v23 = vld [vmem:[%s335_s1 + $0x78] sm:$0xff]  ;;  %v33_v25 = vld [vmem:[%s336_s0] sm:$0xff]  ;;  %v34_v26 = vld [vmem:[%s336_s0 + $0x8] sm:$0xff] }
   0x7   :  { %v59_v24 = vpack.c.bf16 %v51_v23, %v50_v22  ;;  %v35_v27 = vpack.c.bf16 %v34_v26, %v33_v25  ;;  %v175_v36 = vld [vmem:[%s337_s2] ss:$0 sm:$0xff]  ;;  %v121_v41 = vld [vmem:[%s338_s3 + $0x8] sm:$0xff] }
   0x8   :  { %190 = vmatpush3.bf16.msra.mxu0 %v53_v6  ;;  %v31_v28 = vld [vmem:[#allocation2] sm:$0xff] }
   0x9   :  { %191 = vmatprep.subr.bf16.mxu0 %v213_v0  ;;  %v32_v30 = vld [vmem:[#allocation2 + $0x8] sm:$0xff]  ;;  %v120_v38 = vld [vmem:[%s338_s3] sm:$0xff] }
   0xa   :  { %v177_v2 = vld [vmem:[%s340_s5] ss:$0 sm:$0xff] }
   0xc   :  { %192 = vmatpush3.bf16.msra.mxu0 %v54_v9 }
   0xd   :  { %193 = vmatprep.subr.bf16.mxu0 %v213_v0 }
  0x10   :  { %194 = vmatpush3.bf16.msra.mxu0 %v55_v12 }
  0x11   :  { %195 = vmatprep.subr.bf16.mxu0 %v213_v0 }
  0x14   :  { %196 = vmatpush3.bf16.msra.mxu0 %v56_v15 }
  0x15   :  { %197 = vmatprep.subr.bf16.mxu0 %v213_v0 }
  0x18   :  { %198 = vmatpush3.bf16.msra.mxu0 %v57_v18 }
  0x19   :  { %199 = vmatprep.subr.bf16.mxu0 %v213_v0 }
  0x1c   :  { %200 = vmatpush3.bf16.msra.mxu0 %v58_v21 }
  0x1d   :  { %201 = vmatprep.subr.bf16.mxu0 %v213_v0  ;;  %v176_v0 = vld [vmem:[%s339_s4] ss:$0 sm:$0xff] }
  0x20   :  { %202 = vmatpush3.bf16.msra.mxu0 %v59_v24 }
  0x23   :  { %204 = vmatmul.mubr.bf16.vlgmr.msra.gmra.mrb[0].mxu0 %v35_v27 }
  0xf6   :  { %v94_v29 = vpop.f32.mrb[0].mxu0 }
  0xf7   :  { %v101_v31 = vadd.f32 %v94_v29, %v31_v28  ;;  %v205_v32 = vpop.f32.mrb[1].mxu0 }
  0xf8   :  { %v97_v33 = vpop.f32.mrb[2].mxu0 }
  0xf9   :  { %104 = vst.msk [vmem:[#allocation2] sm:$0xff] %vm28_vm0, %v101_v31  ;;  %v102_v34 = vadd.f32 %v97_v33, %v32_v30  ;;  %v206_v35 = vpop.f32.mrb[3].mxu0 }
  0xfb   :  { %105 = vst.msk [vmem:[#allocation2 + $0x8] sm:$0xff] %vm28_vm0, %v102_v34 }
 0x100   :  { %v109_v37 = vld [vmem:[#allocation2] sm:$0xff] }
 0x101   :  { %v118_v39 = vadd.f32 %v175_v36, %v109_v37 }
 0x102   :  { %v110_v40 = vld [vmem:[#allocation2 + $0x8] sm:$0xff] }
 0x103   :  { %v122_v42 = vadd.f32 %v120_v38, %v118_v39  ;;  %v119_v43 = vadd.f32 %v175_v36, %v110_v40 }
 0x105   :  { %v124_v44 = vsel %vm28_vm0, %v122_v42, 0.0  ;;  %v123_v45 = vadd.f32 %v121_v41, %v119_v43 }
 0x106   :  { %125 = vadd.xlane.f32.xlu0 %v124_v44 }
 0x107   :  { %v127_v46 = vsel %vm28_vm0, %v123_v45, 0.0 }
 0x10a   :  { %128 = vadd.xlane.f32.xlu0 %v127_v46 }
 0x193   :  { %v126_v47 = vpop.xlane.xlu0 %125 }
 0x194   :  { %v131_v48 = vmul.f32 0.015625, %v126_v47 }
 0x196   :  { %v133_v49 = vsub.f32 %v122_v42, %v131_v48 }
 0x197   :  { %v129_v50 = vpop.xlane.xlu0 %128 }
 0x198   :  { %v132_v51 = vmul.f32 0.015625, %v129_v50  ;;  %v135_v52 = vmul.f32 %v133_v49, %v133_v49 }
 0x19a   :  { %v134_v53 = vsub.f32 %v123_v45, %v132_v51  ;;  %v137_v54 = vsel %vm28_vm0, %v135_v52, 0.0 }
 0x19b   :  { %138 = vadd.xlane.f32.xlu1 %v137_v54 }
 0x19c   :  { %v136_v55 = vmul.f32 %v134_v53, %v134_v53 }
 0x19e   :  { %v140_v56 = vsel %vm28_vm0, %v136_v55, 0.0 }
 0x19f   :  { %141 = vadd.xlane.f32.xlu1 %v140_v56 }
 0x228   :  { %v139_v57 = vpop.xlane.xlu1 %138 }
 0x229   :  { %v143_v58 = vmul.f32 0.015625, %v139_v57 }
 0x22b   :  { %v145_v59 = vadd.f32 1e-05, %v143_v58 }
 0x22c   :  { %v142_v60 = vpop.xlane.xlu1 %141 }
 0x22d   :  { %209 = vrsqrt.f32 %v145_v59  ;;  %v144_v61 = vmul.f32 0.015625, %v142_v60 }
 0x22f   :  { %v146_v62 = vadd.f32 1e-05, %v144_v61 }
 0x231   :  { %211 = vrsqrt.f32 %v146_v62 }
 0x237   :  { %v210_v63 = vpop.eup %209 }
 0x238   :  { %v149_v1 = vmul.f32 %v210_v63, %v133_v49 }
 0x23a   :  { %v158_v3 = vmul.f32 %v176_v0, %v149_v1 }
 0x23b   :  { %v212_v4 = vpop.eup %211 }
 0x23c   :  { %v167_v5 = vadd.f32 %v177_v2, %v158_v3  ;;  %v150_v6 = vmul.f32 %v212_v4, %v134_v53 }
 0x23e   :  { %169 = vst.msk [vmem:[%s341_s6] sm:$0xff] %vm28_vm0, %v167_v5  ;;  %v159_v7 = vmul.f32 %v176_v0, %v150_v6 }
 0x240   :  { %v168_v8 = vadd.f32 %v177_v2, %v159_v7 }
 0x242   :  { %170 = vst.msk [vmem:[%s341_s6 + $0x8] sm:$0xff] %vm28_vm0, %v168_v8 }

// kernel: bart_forward.46
= control target key start
LH: loop header
LB: loop body
LE: loop exit
PB: predicated region body
PF: predicated region fallthrough
CT: control target
= control target key end

     0   :  { %vm19_vm0 = vcmask 523264   ;;  %v129_v0 = vmov 0.0   ;;  %vm130_vm1 = vmmov 0   ;;  %s197_s1 = inlined_call_operand.vmem [shape: f32[64,64], index: 1, kind: input, shape index: {}]   ;;  %s198_s0 = inlined_call_operand.vmem [shape: f32[16,64], index: 0, kind: input, shape index: {}]   ;;  %s199_s2 = inlined_call_operand.vmem [shape: f32[1,64], index: 2, kind: input, shape index: {}]   ;;  %s200_s3 = inlined_call_operand.vmem [shape: f32[16,64], index: 3, kind: output, shape index: {}]  }
   0x1   :  { %115 = vmatprep.subr.bf16.mxu0 %v129_v0  ;;  %v27_v1 = vld [vmem:[%s197_s1] sm:$0xff]  ;;  %v28_v2 = vld [vmem:[%s197_s1 + $0x8] sm:$0xff]  ;;  %v29_v3 = vld [vmem:[%s197_s1 + $0x10] sm:$0xff]  ;;  %123 = vmatprep.mubr.msk.bf16.mxu0 %vm130_vm1, %v129_v0  ;;  %20 = vst.msk [vmem:[#allocation2] sm:$0xff] %vm19_vm0, %v129_v0 }
   0x2   :  { %21 = vst.msk [vmem:[#allocation2 + $0x8] sm:$0xff] %vm19_vm0, %v129_v0  ;;  %v35_v4 = vpack.c.bf16 %v28_v2, %v27_v1  ;;  %v30_v5 = vld [vmem:[%s197_s1 + $0x18] sm:$0xff]  ;;  %v31_v7 = vld [vmem:[%s197_s1 + $0x20] sm:$0xff]  ;;  %v32_v8 = vld [vmem:[%s197_s1 + $0x28] sm:$0xff] }
   0x3   :  { %v36_v6 = vpack.c.bf16 %v30_v5, %v29_v3  ;;  %v37_v9 = vpack.c.bf16 %v32_v8, %v31_v7  ;;  %v33_v10 = vld [vmem:[%s197_s1 + $0x30] sm:$0xff]  ;;  %v34_v11 = vld [vmem:[%s197_s1 + $0x38] sm:$0xff]  ;;  %v24_v13 = vld [vmem:[%s198_s0] sm:$0xff] }
   0x4   :  { %116 = vmatpush3.bf16.msra.mxu0 %v35_v4  ;;  %v38_v12 = vpack.c.bf16 %v34_v11, %v33_v10  ;;  %v25_v14 = vld [vmem:[%s198_s0 + $0x8] sm:$0xff]  ;;  %v109_v24 = vld [vmem:[%s199_s2] ss:$0 sm:$0xff] }
   0x5   :  { %117 = vmatprep.subr.bf16.mxu0 %v129_v0  ;;  %v26_v15 = vpack.c.bf16 %v25_v14, %v24_v13 }
   0x8   :  { %118 = vmatpush3.bf16.msra.mxu0 %v36_v6  ;;  %v22_v16 = vld [vmem:[#allocation2] sm:$0xff] }
   0x9   :  { %119 = vmatprep.subr.bf16.mxu0 %v129_v0  ;;  %v23_v18 = vld [vmem:[#allocation2 + $0x8] sm:$0xff] }
   0xc   :  { %120 = vmatpush3.bf16.msra.mxu0 %v37_v9 }
   0xd   :  { %121 = vmatprep.subr.bf16.mxu0 %v129_v0 }
  0x10   :  { %122 = vmatpush3.bf16.msra.mxu0 %v38_v12 }
  0x13   :  { %124 = vmatmul.mubr.msk.bf16.vlgmr.msra.gmra.mrb[0].mxu0 %vm19_vm0, %v26_v15 }
  0xe6   :  { %v77_v17 = vpop.f32.mrb[0].mxu0 }
  0xe7   :  { %v84_v19 = vadd.f32 %v77_v17, %v22_v16  ;;  %v125_v20 = vpop.f32.mrb[1].mxu0 }
  0xe8   :  { %v80_v21 = vpop.f32.mrb[2].mxu0 }
  0xe9   :  { %86 = vst.msk [vmem:[#allocation2] sm:$0xff] %vm19_vm0, %v84_v19  ;;  %v85_v22 = vadd.f32 %v80_v21, %v23_v18  ;;  %v126_v23 = vpop.f32.mrb[3].mxu0 }
  0xeb   :  { %87 = vst.msk [vmem:[#allocation2 + $0x8] sm:$0xff] %vm19_vm0, %v85_v22 }
  0xf0   :  { %v91_v25 = vld [vmem:[#allocation2] sm:$0xff] }
  0xf1   :  { %v100_v26 = vadd.f32 %v109_v24, %v91_v25 }
  0xf2   :  { %v92_v27 = vld [vmem:[#allocation2 + $0x8] sm:$0xff] }
  0xf3   :  { %102 = vst.msk [vmem:[%s200_s3] sm:$0xff] %vm19_vm0, %v100_v26  ;;  %v101_v28 = vadd.f32 %v109_v24, %v92_v27 }
  0xf5   :  { %103 = vst.msk [vmem:[%s200_s3 + $0x8] sm:$0xff] %vm19_vm0, %v101_v28 }

// kernel: bart_forward.44
= control target key start
LH: loop header
LB: loop body
LE: loop exit
PB: predicated region body
PF: predicated region fallthrough
CT: control target
= control target key end

     0   :  { %s568_s9 = smov 0   ;;  %s616_s0 = inlined_call_operand.vmem [shape: f32[2,8,192], index: 0, kind: input, shape index: {}]   ;;  %s617_s1 = inlined_call_operand.vmem [shape: f32[2,1,8], index: 1, kind: input, shape index: {}]   ;;  %s618_s2 = inlined_call_operand.vmem [shape: f32[2,8,64], index: 2, kind: output, shape index: {}]  }
   0x1 LB: > { %s469_s10 = sadd.s32 4294967295, %s545_s9   ;;  %p473_p0 = scmp.ge.s32.totalorder %s545_s9, 1  ;;  %s545_s9 = sphi %s568_s9, %s12_s9  }
   0x2   : > { %p120_p1 = scmp.lt.s32.totalorder %s545_s9, 3 }
   0x4   : > { %p121_p2 = pnand %p473_p0, %p120_p1 }
   0x5   : > { %p144_p3 = scmp.lt.s32.totalorder (!%p121_p2), %s469_s10, 1  ;;  %v547_v0 = vmov (!%p121_p2), 0.0   ;;  %vm548_vm0 = vmmov (!%p121_p2), 0   ;;  %s549_s15 = smov (!%p121_p2), 64   ;;  %vm178_vm1 = vcmask (!%p121_p2), 261120   ;;  %v161_v7 = vlaneseq (!%p121_p2) }
   0x6   : > { %124 = sbr.rel (%p121_p2) target bundleno = 1233 (0x4d1), region = 28  ;;  %493 = vmatprep.subr.bf16.mxu0 (!%p121_p2), %v547_v0  ;;  %495 = vmatprep.mubr.msk.bf16.mxu0 (!%p121_p2), %vm548_vm0, %v547_v0  ;;  %s550_s16 = smov (!%p121_p2), 32   ;;  %v552_v12 = vmov (!%p121_p2), -1e+09   ;;  %vm226_vm3 = vcmask (!%p121_p2), 64512   ;;  %vm241_vm4 = vcmask (!%p121_p2), 1043456  }
   0x7   : > { %499 = vmatprep.subr.bf16.mxu1 (!%p121_p2), %v547_v0  ;;  %501 = vmatprep.mubr.msk.bf16.mxu1 (!%p121_p2), %vm548_vm0, %v547_v0  ;;  %s551_s17 = smov (!%p121_p2), 96   ;;  %v162_v8 = vshrl.u32 (!%p121_p2), %v161_v7, 7  ;;  %v164_v9 = vand.u32 (!%p121_p2), 127, %v161_v7  ;;  %vm405_vm5 = vcmask (!%p121_p2), 523264  }
   0x9   : > { %vm165_vm2 = vcmp.ge.s32.totalorder (!%p121_p2), %v162_v8, %v164_v9 }
   0xa   : > { %v166_v13 = vsel (!%p121_p2), %vm165_vm2, 0.0, %v552_v12 }
   0xd   : > { %s620_s10 = smov (!%p144_p3, %s469_s10), 1 }
   0xe   : > { %s484_s11 = sshll.u32 %s620_s10, 4  ;;  %s151_s20 = scalar_lea.vmem %s617_s1, %s620_s10 }
   0xf   : > { %s584_s14 = scalar_lea.vmem %s616_s0, %s484_s11  ;;  %v477_v10 = vld [vmem:[%s151_s20] ss:$0 sm:$0xff]  ;;  %s476_s21 = sshll.u32 %s620_s10, 3 }
  0x10   : > { %v157_v1 = vld [vmem:[%s584_s14] sm:$0xff]  ;;  %v158_v20 = vld [vmem:[%s584_s14 + $0x8] sm:$0xff]  ;;  %s155_s24 = scalar_lea.vmem %s618_s2, %s476_s21 }
  0x11   : > { %v168_v2 = vpack.c.bf16 %v157_v1, %v157_v1  ;;  %v160_v4 = vmul.f32 0.17677669, %v157_v1  ;;  %v237_v21 = vpack.c.bf16 %v158_v20, %v158_v20 }
  0x13   : > { %176 = vrot.lane.b32.xlu0 %v168_v2, %s549_s15  ;;  %v167_v6 = vpack.c.bf16 %v160_v4, %v160_v4  ;;  %290 = vrot.lane.b32.xlu1 %v168_v2, %s550_s16  ;;  %v243_v22 = vsel %vm241_vm4, %v237_v21, 0 }
  0x14   : > { %500 = vmatpush3.bf16.msra.mxu1 %v243_v22 }
  0x15   : > { %505 = vmatprep.subr.bf16.mxu1 %v547_v0 }
  0x17   : > { %288 = vrot.lane.b32.xlu1 %v167_v6, %s551_s17 }
  0x85   : > { %v177_v3 = vpop.permute.xlu0 %176  ;;  %v291_v26 = vpop.permute.xlu1 %290 }
  0x86   : > { %v183_v5 = vsel %vm178_vm1, %v177_v3, 0  ;;  %v296_v28 = vsel %vm178_vm1, %v291_v26, 0 }
  0x87   : > { %494 = vmatpush3.bf16.xpose.msra.mxu0 %v183_v5 }
  0x88   : > { %511 = vmatprep.subr.bf16.mxu0 %v547_v0 }
  0x89   : > { %v289_v30 = vpop.permute.xlu1 %288 }
  0x8e   : > { %496 = vmatmul.mubr.msk.bf16.vlgmr.msra.gmra.mrb[0].mxu0 %vm178_vm1, %v167_v6 }
  0x8f   : > { %513 = vmatprep.mubr.msk.bf16.mxu0 %vm548_vm0, %v547_v0 }
 0x161   : > { %v219_v11 = vpop.f32.mrb[0].mxu0 }
 0x162   : > { %v220_v14 = vadd.f32 %v477_v10, %v219_v11  ;;  %v497_v15 = vpop.f32.mrb[1].mxu0 }
 0x163   : > { %v222_v16 = vpop.f32.mrb[2].mxu0 }
 0x164   : > { %v498_v17 = vpop.f32.mrb[3].mxu0  ;;  %v225_v18 = vadd.f32 %v220_v14, %v166_v13 }
 0x166   : > { %v227_v19 = vsel %vm226_vm3, %v225_v18, -inf }
 0x167   : > { %228 = vmax.xlane.f32.xlu0 %v227_v19 }
 0x17d   : > { %350 = vrot.lane.b32.xlu0 %v237_v21, %s551_s17 }
 0x1f4   : > { %v229_v23 = vpop.xlane.xlu0 %228 }
 0x1f5   : > { %v230_v24 = vsub.f32 %v225_v18, %v229_v23 }
 0x1f7   : > { %v231_v25 = vmul.f32 1.442695, %v230_v24 }
 0x1f8   : > { %v351_v42 = vpop.permute.xlu0 %350 }
 0x1f9   : > { %531 = vpow2.f32 %v231_v25  ;;  %v356_v43 = vsel %vm241_vm4, %v351_v42, 0 }
 0x1fa   : > { %512 = vmatpush3.bf16.msra.mxu0 %v356_v43 }
 0x203   : > { %v532_v27 = vpop.eup %531 }
 0x204   : > { %v236_v29 = vpack.c.bf16 %v532_v27, %v532_v27  ;;  %v233_v50 = vsel %vm226_vm3, %v532_v27, 0.0 }
 0x206   : > { %502 = vmatmul.mubr.msk.bf16.vlgmr.msra.gmra.mrb[0].mxu1 %vm226_vm3, %v236_v29 }
 0x207   : > { %506 = vmatpush3.bf16.xpose.msra.mxu1 %v296_v28  ;;  %507 = vmatprep.mubr.msk.bf16.mxu1 %vm548_vm0, %v547_v0 }
 0x20e   : > { %508 = vmatmul.mubr.msk.bf16.vlgmr.msra.gmra.mrb[4].mxu1 %vm178_vm1, %v289_v30 }
 0x2d9   : > { %v279_v31 = vpop.f32.mrb[0].mxu1 }
 0x2da   : > { %v503_v32 = vpop.f32.mrb[1].mxu1 }
 0x2db   : > { %v282_v33 = vpop.f32.mrb[2].mxu1 }
 0x2dc   : > { %v504_v34 = vpop.f32.mrb[3].mxu1 }
 0x2e1   : > { %v332_v35 = vpop.f32.mrb[4].mxu1 }
 0x2e2   : > { %v333_v36 = vadd.f32 %v477_v10, %v332_v35  ;;  %v509_v37 = vpop.f32.mrb[5].mxu1 }
 0x2e3   : > { %v335_v38 = vpop.f32.mrb[6].mxu1 }
 0x2e4   : > { %v510_v39 = vpop.f32.mrb[7].mxu1  ;;  %v338_v40 = vadd.f32 %v333_v36, %v166_v13 }
 0x2e6   : > { %v339_v41 = vsel %vm226_vm3, %v338_v40, -inf }
 0x2e7   : > { %340 = vmax.xlane.f32.xlu1 %v339_v41 }
 0x374   : > { %v341_v44 = vpop.xlane.xlu1 %340 }
 0x375   : > { %v342_v45 = vsub.f32 %v338_v40, %v341_v44 }
 0x377   : > { %v343_v46 = vmul.f32 1.442695, %v342_v45 }
 0x379   : > { %533 = vpow2.f32 %v343_v46 }
 0x383   : > { %v534_v47 = vpop.eup %533 }
 0x384   : > { %v345_v48 = vsel %vm226_vm3, %v534_v47, 0.0  ;;  %v348_v49 = vpack.c.bf16 %v534_v47, %v534_v47 }
 0x385   : > { %346 = vadd.xlane.f32.xlu1 %v345_v48 }
 0x386   : > { %514 = vmatmul.mubr.msk.bf16.vlgmr.msra.gmra.mrb[4].mxu0 %vm226_vm3, %v348_v49 }
 0x389   : > { %234 = vadd.xlane.f32.xlu1 %v233_v50 }
 0x412   : > { %v347_v51 = vpop.xlane.xlu1 %346 }
 0x413   : > { %535 = vrcp.f32 %v347_v51 }
 0x416   : > { %v235_v58 = vpop.xlane.xlu1 %234 }
 0x417   : > { %537 = vrcp.f32 %v235_v58 }
 0x41d   : > { %v536_v52 = vpop.eup %535 }
 0x421   : > { %v538_v59 = vpop.eup %537 }
 0x422   : > { %v286_v60 = vmul.f32 %v538_v59, %v279_v31 }
 0x459   : > { %v392_v53 = vpop.f32.mrb[4].mxu0 }
 0x45a   : > { %v399_v54 = vmul.f32 %v536_v52, %v392_v53  ;;  %v515_v55 = vpop.f32.mrb[5].mxu0 }
 0x45b   : > { %v395_v56 = vpop.f32.mrb[6].mxu0 }
 0x45c   : > { %401 = vrot.lane.b32.xlu1 %v399_v54, %s550_s16  ;;  %v516_v57 = vpop.f32.mrb[7].mxu0 }
 0x4ce   : > { %v402_v61 = vpop.permute.xlu1 %401 }
 0x4cf   : > { %v404_v62 = vsel %vm178_vm1, %v286_v60, %v402_v61 }
 0x4d0   : > { %406 = vst.msk [vmem:[%s155_s24] sm:$0xff] %vm405_vm5, %v404_v62 }
 0x4d1 PF: > { %s12_s9 = sadd.s32 1, %s545_s9  }
 0x4d2   : > { %p9_p4 = scmp.ge.s32.totalorder %s12_s9, 4  }
 0x4d4   :  { %11 = sbr.rel (!%p9_p4) target bundleno = 1 (0x1), region = 61 }

// kernel: bart_forward.48
= control target key start
LH: loop header
LB: loop body
LE: loop exit
PB: predicated region body
PF: predicated region fallthrough
CT: control target
= control target key end

     0   :  { %s613_s12 = smov 0   ;;  %s660_s0 = inlined_call_operand.vmem [shape: f32[2,8,64], index: 0, kind: input, shape index: {}]   ;;  %s661_s1 = inlined_call_operand.vmem [shape: f32[2,8,128], index: 1, kind: input, shape index: {}]   ;;  %s662_s2 = inlined_call_operand.vmem [shape: f32[2,1,8], index: 2, kind: input, shape index: {}]   ;;  %s663_s3 = inlined_call_operand.vmem [shape: f32[2,8,64], index: 3, kind: output, shape index: {}]  }
   0x1 LB: > { %s512_s13 = sadd.s32 4294967295, %s586_s12   ;;  %p516_p0 = scmp.ge.s32.totalorder %s586_s12, 1  ;;  %s586_s12 = sphi %s613_s12, %s13_s12  }
   0x2   : > { %p153_p1 = scmp.lt.s32.totalorder %s586_s12, 3 }
   0x4   : > { %p154_p2 = pnand %p516_p0, %p153_p1 }
   0x5   : > { %p182_p3 = scmp.lt.s32.totalorder (!%p154_p2), %s512_s13, 1  ;;  %v588_v0 = vmov (!%p154_p2), 0.0   ;;  %vm589_vm0 = vmmov (!%p154_p2), 0   ;;  %vm210_vm1 = vcmask (!%p154_p2), 261120   ;;  %s590_s21 = smov (!%p154_p2), 96   ;;  %vm257_vm2 = vcmask (!%p154_p2), 64512  }
   0x6   : > { %157 = sbr.rel (%p154_p2) target bundleno = 1114 (0x45a), region = 32  ;;  %535 = vmatprep.subr.bf16.mxu0 (!%p154_p2), %v588_v0  ;;  %537 = vmatprep.mubr.msk.bf16.mxu0 (!%p154_p2), %vm589_vm0, %v588_v0  ;;  %s591_s25 = smov (!%p154_p2), 64   ;;  %vm274_vm3 = vcmask (!%p154_p2), 1043456   ;;  %vm436_vm4 = vcmask (!%p154_p2), 523264  }
   0x7   : > { %541 = vmatprep.subr.bf16.mxu1 (!%p154_p2), %v588_v0  ;;  %543 = vmatprep.mubr.msk.bf16.mxu1 (!%p154_p2), %vm589_vm0, %v588_v0  ;;  %s592_s26 = smov (!%p154_p2), 32  }
   0xd   : > { %s665_s13 = smov (!%p182_p3, %s512_s13), 1 }
   0xe   : > { %s623_s14 = sshll.u32 %s665_s13, 3  ;;  %s192_s24 = scalar_lea.vmem %s662_s2, %s665_s13 }
   0xf   : > { %s189_s17 = scalar_lea.vmem %s661_s1, %s623_s14  ;;  %s185_s20 = scalar_lea.vmem %s660_s0, %s623_s14  ;;  %v520_v7 = vld [vmem:[%s192_s24] ss:$0 sm:$0xff] }
  0x10   : > { %v199_v1 = vld [vmem:[%s189_s17] sm:$0xff]  ;;  %s196_s29 = scalar_lea.vmem %s663_s3, %s623_s14 }
  0x11   : > { %v198_v2 = vld [vmem:[%s185_s20] sm:$0xff]  ;;  %v203_v3 = vpack.c.bf16 %v199_v1, %v199_v1 }
  0x12   : > { %v201_v5 = vmul.f32 0.17677669, %v198_v2 }
  0x13   : > { %v215_v4 = vsel %vm210_vm1, %v203_v3, 0  ;;  %323 = vrot.lane.b32.xlu1 %v203_v3, %s590_s21 }
  0x14   : > { %536 = vmatpush3.bf16.xpose.msra.mxu0 %v215_v4  ;;  %v202_v6 = vpack.c.bf16 %v201_v5, %v201_v5 }
  0x15   : > { %553 = vmatprep.subr.bf16.mxu0 %v588_v0 }
  0x17   : > { %321 = vrot.lane.b32.xlu1 %v202_v6, %s590_s21 }
  0x1b   : > { %538 = vmatmul.mubr.msk.bf16.vlgmr.msra.gmra.mrb[0].mxu0 %vm210_vm1, %v202_v6 }
  0x1c   : > { %555 = vmatprep.mubr.msk.bf16.mxu0 %vm589_vm0, %v588_v0 }
  0x85   : > { %v324_v19 = vpop.permute.xlu1 %323 }
  0x86   : > { %v329_v21 = vsel %vm210_vm1, %v324_v19, 0 }
  0x89   : > { %v322_v23 = vpop.permute.xlu1 %321 }
  0xee   : > { %v251_v8 = vpop.f32.mrb[0].mxu0 }
  0xef   : > { %v252_v9 = vadd.f32 %v520_v7, %v251_v8  ;;  %v539_v10 = vpop.f32.mrb[1].mxu0 }
  0xf0   : > { %v254_v11 = vpop.f32.mrb[2].mxu0 }
  0xf1   : > { %v540_v12 = vpop.f32.mrb[3].mxu0  ;;  %v258_v13 = vsel %vm257_vm2, %v252_v9, -inf }
  0xf2   : > { %259 = vmax.xlane.f32.xlu0 %v258_v13 }
 0x108   : > { %269 = vrot.lane.b32.xlu0 %v203_v3, %s591_s25 }
 0x10c   : > { %381 = vrot.lane.b32.xlu0 %v203_v3, %s592_s26 }
 0x17f   : > { %v260_v14 = vpop.xlane.xlu0 %259 }
 0x180   : > { %v261_v15 = vsub.f32 %v252_v9, %v260_v14 }
 0x182   : > { %v262_v16 = vmul.f32 1.442695, %v261_v15 }
 0x183   : > { %v270_v17 = vpop.permute.xlu0 %269 }
 0x184   : > { %572 = vpow2.f32 %v262_v16  ;;  %v276_v18 = vsel %vm274_vm3, %v270_v17, 0 }
 0x185   : > { %542 = vmatpush3.bf16.msra.mxu1 %v276_v18 }
 0x186   : > { %547 = vmatprep.subr.bf16.mxu1 %v588_v0 }
 0x187   : > { %v382_v35 = vpop.permute.xlu0 %381 }
 0x188   : > { %v387_v36 = vsel %vm274_vm3, %v382_v35, 0 }
 0x189   : > { %554 = vmatpush3.bf16.msra.mxu0 %v387_v36 }
 0x18e   : > { %v573_v20 = vpop.eup %572 }
 0x18f   : > { %v267_v22 = vpack.c.bf16 %v573_v20, %v573_v20  ;;  %v264_v34 = vsel %vm257_vm2, %v573_v20, 0.0 }
 0x191   : > { %544 = vmatmul.mubr.msk.bf16.vlgmr.msra.gmra.mrb[0].mxu1 %vm257_vm2, %v267_v22 }
 0x192   : > { %548 = vmatpush3.bf16.xpose.msra.mxu1 %v329_v21  ;;  %549 = vmatprep.mubr.msk.bf16.mxu1 %vm589_vm0, %v588_v0 }
 0x199   : > { %550 = vmatmul.mubr.msk.bf16.vlgmr.msra.gmra.mrb[4].mxu1 %vm210_vm1, %v322_v23 }
 0x264   : > { %v312_v24 = vpop.f32.mrb[0].mxu1 }
 0x265   : > { %v545_v25 = vpop.f32.mrb[1].mxu1 }
 0x266   : > { %v315_v26 = vpop.f32.mrb[2].mxu1 }
 0x267   : > { %v546_v27 = vpop.f32.mrb[3].mxu1 }
 0x26c   : > { %v365_v28 = vpop.f32.mrb[4].mxu1 }
 0x26d   : > { %v366_v29 = vadd.f32 %v520_v7, %v365_v28  ;;  %v551_v30 = vpop.f32.mrb[5].mxu1 }
 0x26e   : > { %v368_v31 = vpop.f32.mrb[6].mxu1 }
 0x26f   : > { %v552_v32 = vpop.f32.mrb[7].mxu1  ;;  %v371_v33 = vsel %vm257_vm2, %v366_v29, -inf }
 0x270   : > { %372 = vmax.xlane.f32.xlu1 %v371_v33 }
 0x274   : > { %265 = vadd.xlane.f32.xlu1 %v264_v34 }
 0x2fd   : > { %v373_v37 = vpop.xlane.xlu1 %372 }
 0x2fe   : > { %v374_v38 = vsub.f32 %v366_v29, %v373_v37 }
 0x300   : > { %v375_v39 = vmul.f32 1.442695, %v374_v38 }
 0x301   : > { %v266_v50 = vpop.xlane.xlu1 %265 }
 0x302   : > { %574 = vpow2.f32 %v375_v39 }
 0x30c   : > { %v575_v40 = vpop.eup %574 }
 0x30d   : > { %v377_v41 = vsel %vm257_vm2, %v575_v40, 0.0  ;;  %v380_v42 = vpack.c.bf16 %v575_v40, %v575_v40 }
 0x30e   : > { %378 = vadd.xlane.f32.xlu0 %v377_v41 }
 0x30f   : > { %556 = vmatmul.mubr.msk.bf16.vlgmr.msra.gmra.mrb[4].mxu0 %vm257_vm2, %v380_v42 }
 0x39b   : > { %v379_v43 = vpop.xlane.xlu0 %378 }
 0x39c   : > { %576 = vrcp.f32 %v379_v43 }
 0x39d   : > { %578 = vrcp.f32 %v266_v50 }
 0x3a6   : > { %v577_v44 = vpop.eup %576 }
 0x3a7   : > { %v579_v51 = vpop.eup %578 }
 0x3a8   : > { %v319_v52 = vmul.f32 %v579_v51, %v312_v24 }
 0x3e2   : > { %v423_v45 = vpop.f32.mrb[4].mxu0 }
 0x3e3   : > { %v430_v46 = vmul.f32 %v577_v44, %v423_v45  ;;  %v557_v47 = vpop.f32.mrb[5].mxu0 }
 0x3e4   : > { %v426_v48 = vpop.f32.mrb[6].mxu0 }
 0x3e5   : > { %432 = vrot.lane.b32.xlu1 %v430_v46, %s592_s26  ;;  %v558_v49 = vpop.f32.mrb[7].mxu0 }
 0x457   : > { %v433_v53 = vpop.permute.xlu1 %432 }
 0x458   : > { %v435_v54 = vsel %vm210_vm1, %v319_v52, %v433_v53 }
 0x459   : > { %437 = vst.msk [vmem:[%s196_s29] sm:$0xff] %vm436_vm4, %v435_v54 }
 0x45a PF: > { %s13_s12 = sadd.s32 1, %s586_s12  }
 0x45b   : > { %p10_p4 = scmp.ge.s32.totalorder %s13_s12, 4  }
 0x45d   :  { %12 = sbr.rel (!%p10_p4) target bundleno = 1 (0x1), region = 68 }

// kernel: bart_forward.61
= control target key start
LH: loop header
LB: loop body
LE: loop exit
PB: predicated region body
PF: predicated region fallthrough
CT: control target
= control target key end

     0   :  { %vm51_vm0 = vcmask 523264   ;;  %v216_v2 = vmov 0.0   ;;  %vm217_vm1 = vmmov 0   ;;  %s319_s0 = inlined_call_operand.vmem [shape: f32[16,64], index: 0, kind: input, shape index: {}]   ;;  %s320_s1 = inlined_call_operand.vmem [shape: f32[128,64], index: 1, kind: input, shape index: {}]   ;;  %s321_s2 = inlined_call_operand.vmem [shape: f32[1,128], index: 2, kind: input, shape index: {}]   ;;  %s322_s3 = inlined_call_operand.hbm [shape: f32[16,128], index: 3, kind: output, shape index: {}]  }
   0x1   :  { %v27_v0 = vld [vmem:[%s320_s1] sm:$0xff]  ;;  %v28_v1 = vld [vmem:[%s320_s1 + $0x8] sm:$0xff]  ;;  %167 = vmatprep.subr.bf16.mxu0 %v216_v2  ;;  %183 = vmatprep.mubr.msk.bf16.mxu0 %vm217_vm1, %v216_v2  ;;  %v29_v4 = vld [vmem:[%s320_s1 + $0x10] sm:$0xff] }
   0x2   :  { %v43_v3 = vpack.c.bf16 %v28_v1, %v27_v0  ;;  %v30_v5 = vld [vmem:[%s320_s1 + $0x18] sm:$0xff] }
   0x3   :  { %v44_v7 = vpack.c.bf16 %v30_v5, %v29_v4 }
   0x4   :  { %v56_v6 = vsel %vm51_vm0, %v43_v3, 0 }
   0x5   :  { %168 = vmatpush3.bf16.xpose.msra.mxu0 %v56_v6 }
   0x6   :  { %169 = vmatprep.subr.bf16.mxu0 %v216_v2 }
   0x7   :  { %8 = vsyncpa [#allocation4], 0  ;;  %v59_v8 = vsel %vm51_vm0, %v44_v7, 0  ;;  %v31_v9 = vld [vmem:[%s320_s1 + $0x20] sm:$0xff]  ;;  %v32_v10 = vld [vmem:[%s320_s1 + $0x28] sm:$0xff] }
   0x8   :  { %v45_v11 = vpack.c.bf16 %v32_v10, %v31_v9  ;;  %v33_v13 = vld [vmem:[%s320_s1 + $0x30] sm:$0xff]  ;;  %v34_v14 = vld [vmem:[%s320_s1 + $0x38] sm:$0xff]  ;;  %v35_v17 = vld [vmem:[%s320_s1 + $0x40] sm:$0xff] }
   0x9   :  { %v46_v15 = vpack.c.bf16 %v34_v14, %v33_v13  ;;  %v36_v18 = vld [vmem:[%s320_s1 + $0x48] sm:$0xff]  ;;  %v37_v21 = vld [vmem:[%s320_s1 + $0x50] sm:$0xff]  ;;  %v38_v22 = vld [vmem:[%s320_s1 + $0x58] sm:$0xff] }
   0xa   :  { %v62_v12 = vsel %vm51_vm0, %v45_v11, 0  ;;  %v47_v19 = vpack.c.bf16 %v36_v18, %v35_v17  ;;  %v48_v23 = vpack.c.bf16 %v38_v22, %v37_v21  ;;  %v39_v25 = vld [vmem:[%s320_s1 + $0x60] sm:$0xff]  ;;  %v40_v26 = vld [vmem:[%s320_s1 + $0x68] sm:$0xff]  ;;  %v41_v29 = vld [vmem:[%s320_s1 + $0x70] sm:$0xff] }
   0xb   :  { %v65_v16 = vsel %vm51_vm0, %v46_v15, 0  ;;  %v49_v27 = vpack.c.bf16 %v40_v26, %v39_v25  ;;  %v42_v30 = vld [vmem:[%s320_s1 + $0x78] sm:$0xff]  ;;  %v24_v33 = vld [vmem:[%s319_s0] sm:$0xff]  ;;  %v25_v34 = vld [vmem:[%s319_s0 + $0x8] sm:$0xff]  ;;  %s218_s1 = smov [#allocation3]  }
   0xc   :  { %v68_v20 = vsel %vm51_vm0, %v47_v19, 0  ;;  %v71_v24 = vsel %vm51_vm0, %v48_v23, 0  ;;  %v50_v31 = vpack.c.bf16 %v42_v30, %v41_v29  ;;  %v26_v35 = vpack.c.bf16 %v25_v34, %v24_v33  ;;  %v157_v36 = vld [vmem:[%s321_s2] ss:$0 sm:$0xff]  ;;  %s145_s23 = sshll.u32 %s218_s1, 4  ;;  %s146_s23 = int_to_ptr.vmem [resolvable:$true] %s145_s23 }
   0xd   :  { %170 = vmatpush3.bf16.xpose.msra.mxu0 %v59_v8  ;;  %v74_v28 = vsel %vm51_vm0, %v49_v27, 0  ;;  %s192_s24 = scalar_lea.vmem %s146_s23, 256  ;;  %p197_p1 = scmp.lt.s32.totalorder %s146_s23, %s146_s23 }
   0xe   :  { %171 = vmatprep.subr.bf16.mxu0 %v216_v2  ;;  %v77_v32 = vsel %vm51_vm0, %v50_v31, 0  ;;  %p193_p0 = scmp.ne.s32.totalorder %s146_s23, %s192_s24  ;;  %p198_p2 = scmp.lt.s32.totalorder %s192_s24, %s192_s24 }
  0x10   :  { %p199_p3 = por %p198_p2, %p197_p1 }
  0x12   :  { %p200_p4 = pnand %p199_p3, %p193_p0 }
  0x15   :  { %172 = vmatpush3.bf16.xpose.msra.mxu0 %v62_v12 }
  0x16   :  { %173 = vmatprep.subr.bf16.mxu0 %v216_v2 }
  0x1d   :  { %174 = vmatpush3.bf16.xpose.msra.mxu0 %v65_v16 }
  0x1e   :  { %175 = vmatprep.subr.bf16.mxu0 %v216_v2 }
  0x25   :  { %176 = vmatpush3.bf16.xpose.msra.mxu0 %v68_v20 }
  0x26   :  { %177 = vmatprep.subr.bf16.mxu0 %v216_v2 }
  0x2d   :  { %178 = vmatpush3.bf16.xpose.msra.mxu0 %v71_v24 }
  0x2e   :  { %179 = vmatprep.subr.bf16.mxu0 %v216_v2 }
  0x35   :  { %180 = vmatpush3.bf16.xpose.msra.mxu0 %v74_v28 }
  0x36   :  { %181 = vmatprep.subr.bf16.mxu0 %v216_v2 }
  0x3d   :  { %182 = vmatpush3.bf16.xpose.msra.mxu0 %v77_v32 }
  0x44   :  { %184 = vmatmul.mubr.msk.bf16.vlgmr.msra.gmra.mrb[0].mxu0 %vm51_vm0, %v26_v35 }
 0x117   :  { %v113_v37 = vpop.f32.mrb[0].mxu0 }
 0x118   :  { %v136_v38 = vadd.f32 %v157_v36, %v113_v37  ;;  %v185_v39 = vpop.f32.mrb[1].mxu0 }
 0x119   :  { %v116_v40 = vpop.f32.mrb[2].mxu0 }
 0x11a   :  { %138 = vst [vmem:[#allocation3] sm:$0xff] %v136_v38  ;;  %v137_v41 = vadd.f32 %v157_v36, %v116_v40  ;;  %v186_v42 = vpop.f32.mrb[3].mxu0 }
 0x11c   :  { %139 = vst [vmem:[#allocation3 + $0x8] sm:$0xff] %v137_v41 }
 0x11d   :  { %203 = shalt.err (!%p200_p4)
}
 0x11e   :  { %s204_s25 = scalar_lea.hbm %s322_s3, 256 }
 0x11f   :  { %p205_p5 = scmp.ne.s32.totalorder %s322_s3, %s204_s25  ;;  %p208_p6 = scmp.lt.u32.totalorder %s204_s25, %s322_s3 }
 0x121   :  { %p210_p7 = pnand %p208_p6, %p205_p5 }
 0x123   :  { %213 = shalt.err (!%p210_p7)
}
 0x124   :  { %s219_s30 = smov 128   ;;  %s220_s4 = smov 8  }
 0x125   :  { %151 = dma.vmem_to_hbm [thread:$0]  %s146_s23, 256, %s322_s3, [#allocation4], %s219_s30, %s219_s30, %s220_s4  }
 0x126   :  { %214 = dma.done.wait [#allocation4], 256  }
 0x127   :  { %215 = vsyncadd [#allocation4], 4294967040 }
 0x128   :  { %155 = vsyncpa [#allocation4], 1 }

</bundles_post_ra>
